<compile_context>
chip_gen: v7x
topology: tpu7x:2x2x1
jax: 0.10.0
libtpu: 0.0.40
codegen_flags: <defaults>
</compile_context>

<pallas_src>
import jax
import jax.numpy as jnp
import numpy as np
from jax.experimental import pallas as pl
from jax.experimental.pallas import tpu as pltpu


def _nearest_src_indices(in_size: int, out_size: int, scale_factor):
    """PyTorch 'nearest' source indices for each output position (float32 math)."""
    if scale_factor is not None and scale_factor > 0:
        scale = np.float32(1.0) / np.float32(scale_factor)
    else:
        scale = np.float32(in_size) / np.float32(out_size)
    dst = np.arange(out_size, dtype=np.float32)
    src = np.floor(dst * scale).astype(np.int64)
    return np.minimum(src, in_size - 1)


def _round_up(x: int, m: int) -> int:
    return ((x + m - 1) // m) * m


def _make_upsample_kernel(h_counts, w_counts):
    """Kernel factory.  h_counts[h] / w_counts[w] = how many output rows / columns are
    sourced from input row h / column w (nearest indices are non-decreasing, so every
    input index maps to one contiguous run of output indices)."""
    h_counts = tuple(int(c) for c in h_counts)
    w_counts = tuple(int(c) for c in w_counts)

    def kernel(x_ref, o_ref, y_ref):
        # x_ref: (bc, H, W)   input tile
        # y_ref: (bc, H, W_out) VMEM scratch (W-upsampled intermediate)
        # o_ref: (bc, H_out, W_out) output tile
        bc, H, W = x_ref.shape
        W_out = y_ref.shape[2]

        # Pass 1: replicate along W (lane axis): slice one input column, broadcast it to
        # its run length, store into the scratch at the static output offset.
        off = 0
        for w in range(W):
            c = w_counts[w]
            if c == 0:
                continue
            col = x_ref[:, :, w:w + 1]                      # (bc, H, 1)
            if c > 1:
                col = jnp.broadcast_to(col, (bc, H, c))
            y_ref[:, :, off:off + c] = col
            off += c

        # Pass 2: replicate along H (sublane axis): slice one intermediate row, broadcast
        # it to its run length, store lane-dense rows into the output tile.
        off = 0
        for h in range(len(h_counts)):
            c = h_counts[h]
            if c == 0:
                continue
            row = y_ref[:, h:h + 1, :]                      # (bc, 1, W_out)
            if c > 1:
                row = jnp.broadcast_to(row, (bc, c, W_out))
            o_ref[:, off:off + c, :] = row
            off += c

    return kernel


def upsample_nearest2d(x, size=None, scale_factor=None, *, bc_tile=None):
    """x: (N, C, H, W). Matches torch.nn.Upsample(size=size, scale_factor=scale_factor,
    mode='nearest') forward."""
    N, C, H, W = x.shape

    if size is not None:
        if isinstance(size, (tuple, list)):
            H_out, W_out = int(size[0]), int(size[1])
        else:
            H_out = W_out = int(size)
        sf_h = sf_w = None
    else:
        if isinstance(scale_factor, (tuple, list)):
            sf_h, sf_w = float(scale_factor[0]), float(scale_factor[1])
        else:
            sf_h = sf_w = float(scale_factor)
        H_out = int(np.floor(H * sf_h))
        W_out = int(np.floor(W * sf_w))

    h_idx = _nearest_src_indices(H, H_out, sf_h)
    w_idx = _nearest_src_indices(W, W_out, sf_w)
    h_counts = np.bincount(h_idx, minlength=H)
    w_counts = np.bincount(w_idx, minlength=W)

    B = N * C
    x_flat = x.reshape(B, H, W)
    dtype_bytes = jnp.dtype(x.dtype).itemsize

    def _padded_tile_bytes(h, w):
        # VMEM layout pads the minor two dims to (8, 128).
        return _round_up(h, 8) * _round_up(w, 128) * dtype_bytes

    # Per-batch-element VMEM footprint: input tile + output tile + scratch tile.
    per_b = (_padded_tile_bytes(H, W)
             + _padded_tile_bytes(H_out, W_out)
             + _padded_tile_bytes(H, W_out))

    if bc_tile is None:
        VMEM_BUDGET = 16 * 1024 * 1024        # headroom under scoped VMEM on all gens (v7x incl.)
        TARGET_STEP_BYTES = 2 * 1024 * 1024   # ~2 MiB/step: good DMA/compute overlap
        budget_cap = max(1, VMEM_BUDGET // (2 * per_b))   # in/out are double-buffered
        target_cap = max(1, TARGET_STEP_BYTES // per_b)
        bc_tile = min(B, budget_cap, target_cap)
        if B >= 2:
            # Guarantee at least 2 grid steps so the pipeline overlaps and both v7x
            # TensorCores get work via the "parallel" dimension.
            bc_tile = min(bc_tile, max(1, B // 2))
    bc_tile = max(1, min(int(bc_tile), B))
    grid = (pl.cdiv(B, bc_tile),)

    kernel = _make_upsample_kernel(h_counts, w_counts)

    out_flat = pl.pallas_call(
        kernel,
        out_shape=jax.ShapeDtypeStruct((B, H_out, W_out), x.dtype),
        grid_spec=pltpu.PrefetchScalarGridSpec(
            num_scalar_prefetch=0,
            grid=grid,
            in_specs=[pl.BlockSpec((bc_tile, H, W), lambda i: (i, 0, 0))],
            out_specs=pl.BlockSpec((bc_tile, H_out, W_out), lambda i: (i, 0, 0)),
            scratch_shapes=[pltpu.VMEM((bc_tile, H, W_out), x.dtype)],
        ),
        compiler_params=pltpu.CompilerParams(
            dimension_semantics=("parallel",),
            vmem_limit_bytes=32 * 1024 * 1024,
        ),
    )(x_flat)

    return out_flat.reshape(N, C, H_out, W_out)


def _reference_upsample(x, size=None, scale_factor=None):
    N, C, H, W = x.shape
    if size is not None:
        if isinstance(size, (tuple, list)):
            H_out, W_out = int(size[0]), int(size[1])
        else:
            H_out = W_out = int(size)
        sf_h = sf_w = None
    else:
        if isinstance(scale_factor, (tuple, list)):
            sf_h, sf_w = float(scale_factor[0]), float(scale_factor[1])
        else:
            sf_h = sf_w = float(scale_factor)
        H_out = int(np.floor(H * sf_h))
        W_out = int(np.floor(W * sf_w))
    h_idx = _nearest_src_indices(H, H_out, sf_h)
    w_idx = _nearest_src_indices(W, W_out, sf_w)
    return x[:, :, h_idx][:, :, :, w_idx]


if __name__ == "__main__":
    key = jax.random.PRNGKey(0)
    # Small NCHW input consistent with the test module.
    x = jax.random.normal(key, (2, 4, 16, 16), dtype=jnp.float32)

    # Case 1: scale_factor=2.0 -> (2, 4, 32, 32)
    out_sf = jax.block_until_ready(upsample_nearest2d(x, scale_factor=2.0))
    ref_sf = _reference_upsample(np.asarray(x), scale_factor=2.0)
    assert out_sf.shape == (2, 4, 32, 32)
    np.testing.assert_array_equal(np.asarray(out_sf), np.asarray(ref_sf))

    # Case 2: explicit size with non-integer ratio -> (2, 4, 24, 40)
    out_sz = jax.block_until_ready(upsample_nearest2d(x, size=(24, 40)))
    ref_sz = _reference_upsample(np.asarray(x), size=(24, 40))
    assert out_sz.shape == (2, 4, 24, 40)
    np.testing.assert_array_equal(np.asarray(out_sz), np.asarray(ref_sz))

    # Case 3: bf16 stays bf16 and bit-exact (no f32 upcast, pure data movement).
    xb = x.astype(jnp.bfloat16)
    out_bf = jax.block_until_ready(upsample_nearest2d(xb, scale_factor=2.0))
    ref_bf = _reference_upsample(np.asarray(xb), scale_factor=2.0)
    np.testing.assert_array_equal(np.asarray(out_bf).astype(np.float32),
                                  np.asarray(ref_bf).astype(np.float32))

    print("KERNEL_OK")
</pallas_src>

<mosaic_0001>
module attributes {stable_mosaic.version = 11 : i64} {
  func.func @kernel(%arg0: i32, %arg1: memref<4x16x16xf32, #tpu.memory_space<vmem>>, %arg2: memref<4x32x32xf32, #tpu.memory_space<vmem>>, %arg3: memref<4x16x32xf32, #tpu.memory_space<vmem>>) attributes {dimension_semantics = [#tpu.dimension_semantics<parallel>], iteration_bounds = array<i64: 2>, scalar_prefetch = 0 : i64, scratch_operands = 1 : i64, tpu.core_type = #tpu.core_type<tc>, window_params = [{transform_indices = @transform_0, window_bounds = array<i64: 4, 16, 16>}, {transform_indices = @transform_1, window_bounds = array<i64: 4, 32, 32>}]} {
    %c0 = arith.constant 0 : index
    %c0_0 = arith.constant 0 : index
    %c0_1 = arith.constant 0 : index
    %0 = vector.load %arg1[%c0, %c0_0, %c0_1] : memref<4x16x16xf32, #tpu.memory_space<vmem>>, vector<4x16x1xf32>
    %1 = vector.shape_cast %0 : vector<4x16x1xf32> to vector<4x16x1xf32>
    %2 = vector.broadcast %1 : vector<4x16x1xf32> to vector<4x16x2xf32>
    %c0_2 = arith.constant 0 : index
    %c0_3 = arith.constant 0 : index
    %c0_4 = arith.constant 0 : index
    %3 = vector.load %arg3[%c0_2, %c0_3, %c0_4] : memref<4x16x32xf32, #tpu.memory_space<vmem>>, vector<4x16x2xf32>
    tpu.vector_store %arg3[%c0_2, %c0_3, %c0_4], %2 {strides = array<i32>} : memref<4x16x32xf32, #tpu.memory_space<vmem>>, vector<4x16x2xf32>,
    %c0_5 = arith.constant 0 : index
    %c0_6 = arith.constant 0 : index
    %c1 = arith.constant 1 : index
    %4 = vector.load %arg1[%c0_5, %c0_6, %c1] : memref<4x16x16xf32, #tpu.memory_space<vmem>>, vector<4x16x1xf32>
    %5 = vector.shape_cast %4 : vector<4x16x1xf32> to vector<4x16x1xf32>
    %6 = vector.broadcast %5 : vector<4x16x1xf32> to vector<4x16x2xf32>
    %c0_7 = arith.constant 0 : index
    %c0_8 = arith.constant 0 : index
    %c2 = arith.constant 2 : index
    %7 = vector.load %arg3[%c0_7, %c0_8, %c2] : memref<4x16x32xf32, #tpu.memory_space<vmem>>, vector<4x16x2xf32>
    tpu.vector_store %arg3[%c0_7, %c0_8, %c2], %6 {strides = array<i32>} : memref<4x16x32xf32, #tpu.memory_space<vmem>>, vector<4x16x2xf32>,
    %c0_9 = arith.constant 0 : index
    %c0_10 = arith.constant 0 : index
    %c2_11 = arith.constant 2 : index
    %8 = vector.load %arg1[%c0_9, %c0_10, %c2_11] : memref<4x16x16xf32, #tpu.memory_space<vmem>>, vector<4x16x1xf32>
    %9 = vector.shape_cast %8 : vector<4x16x1xf32> to vector<4x16x1xf32>
    %10 = vector.broadcast %9 : vector<4x16x1xf32> to vector<4x16x2xf32>
    %c0_12 = arith.constant 0 : index
    %c0_13 = arith.constant 0 : index
    %c4 = arith.constant 4 : index
    %11 = vector.load %arg3[%c0_12, %c0_13, %c4] : memref<4x16x32xf32, #tpu.memory_space<vmem>>, vector<4x16x2xf32>
    tpu.vector_store %arg3[%c0_12, %c0_13, %c4], %10 {strides = array<i32>} : memref<4x16x32xf32, #tpu.memory_space<vmem>>, vector<4x16x2xf32>,
    %c0_14 = arith.constant 0 : index
    %c0_15 = arith.constant 0 : index
    %c3 = arith.constant 3 : index
    %12 = vector.load %arg1[%c0_14, %c0_15, %c3] : memref<4x16x16xf32, #tpu.memory_space<vmem>>, vector<4x16x1xf32>
    %13 = vector.shape_cast %12 : vector<4x16x1xf32> to vector<4x16x1xf32>
    %14 = vector.broadcast %13 : vector<4x16x1xf32> to vector<4x16x2xf32>
    %c0_16 = arith.constant 0 : index
    %c0_17 = arith.constant 0 : index
    %c6 = arith.constant 6 : index
    %15 = vector.load %arg3[%c0_16, %c0_17, %c6] : memref<4x16x32xf32, #tpu.memory_space<vmem>>, vector<4x16x2xf32>
    tpu.vector_store %arg3[%c0_16, %c0_17, %c6], %14 {strides = array<i32>} : memref<4x16x32xf32, #tpu.memory_space<vmem>>, vector<4x16x2xf32>,
    %c0_18 = arith.constant 0 : index
    %c0_19 = arith.constant 0 : index
    %c4_20 = arith.constant 4 : index
    %16 = vector.load %arg1[%c0_18, %c0_19, %c4_20] : memref<4x16x16xf32, #tpu.memory_space<vmem>>, vector<4x16x1xf32>
    %17 = vector.shape_cast %16 : vector<4x16x1xf32> to vector<4x16x1xf32>
    %18 = vector.broadcast %17 : vector<4x16x1xf32> to vector<4x16x2xf32>
    %c0_21 = arith.constant 0 : index
    %c0_22 = arith.constant 0 : index
    %c8 = arith.constant 8 : index
    %19 = vector.load %arg3[%c0_21, %c0_22, %c8] : memref<4x16x32xf32, #tpu.memory_space<vmem>>, vector<4x16x2xf32>
    tpu.vector_store %arg3[%c0_21, %c0_22, %c8], %18 {strides = array<i32>} : memref<4x16x32xf32, #tpu.memory_space<vmem>>, vector<4x16x2xf32>,
    %c0_23 = arith.constant 0 : index
    %c0_24 = arith.constant 0 : index
    %c5 = arith.constant 5 : index
    %20 = vector.load %arg1[%c0_23, %c0_24, %c5] : memref<4x16x16xf32, #tpu.memory_space<vmem>>, vector<4x16x1xf32>
    %21 = vector.shape_cast %20 : vector<4x16x1xf32> to vector<4x16x1xf32>
    %22 = vector.broadcast %21 : vector<4x16x1xf32> to vector<4x16x2xf32>
    %c0_25 = arith.constant 0 : index
    %c0_26 = arith.constant 0 : index
    %c10 = arith.constant 10 : index
    %23 = vector.load %arg3[%c0_25, %c0_26, %c10] : memref<4x16x32xf32, #tpu.memory_space<vmem>>, vector<4x16x2xf32>
    tpu.vector_store %arg3[%c0_25, %c0_26, %c10], %22 {strides = array<i32>} : memref<4x16x32xf32, #tpu.memory_space<vmem>>, vector<4x16x2xf32>,
    %c0_27 = arith.constant 0 : index
    %c0_28 = arith.constant 0 : index
    %c6_29 = arith.constant 6 : index
    %24 = vector.load %arg1[%c0_27, %c0_28, %c6_29] : memref<4x16x16xf32, #tpu.memory_space<vmem>>, vector<4x16x1xf32>
    %25 = vector.shape_cast %24 : vector<4x16x1xf32> to vector<4x16x1xf32>
    %26 = vector.broadcast %25 : vector<4x16x1xf32> to vector<4x16x2xf32>
    %c0_30 = arith.constant 0 : index
    %c0_31 = arith.constant 0 : index
    %c12 = arith.constant 12 : index
    %27 = vector.load %arg3[%c0_30, %c0_31, %c12] : memref<4x16x32xf32, #tpu.memory_space<vmem>>, vector<4x16x2xf32>
    tpu.vector_store %arg3[%c0_30, %c0_31, %c12], %26 {strides = array<i32>} : memref<4x16x32xf32, #tpu.memory_space<vmem>>, vector<4x16x2xf32>,
    %c0_32 = arith.constant 0 : index
    %c0_33 = arith.constant 0 : index
    %c7 = arith.constant 7 : index
    %28 = vector.load %arg1[%c0_32, %c0_33, %c7] : memref<4x16x16xf32, #tpu.memory_space<vmem>>, vector<4x16x1xf32>
    %29 = vector.shape_cast %28 : vector<4x16x1xf32> to vector<4x16x1xf32>
    %30 = vector.broadcast %29 : vector<4x16x1xf32> to vector<4x16x2xf32>
    %c0_34 = arith.constant 0 : index
    %c0_35 = arith.constant 0 : index
    %c14 = arith.constant 14 : index
    %31 = vector.load %arg3[%c0_34, %c0_35, %c14] : memref<4x16x32xf32, #tpu.memory_space<vmem>>, vector<4x16x2xf32>
    tpu.vector_store %arg3[%c0_34, %c0_35, %c14], %30 {strides = array<i32>} : memref<4x16x32xf32, #tpu.memory_space<vmem>>, vector<4x16x2xf32>,
    %c0_36 = arith.constant 0 : index
    %c0_37 = arith.constant 0 : index
    %c8_38 = arith.constant 8 : index
    %32 = vector.load %arg1[%c0_36, %c0_37, %c8_38] : memref<4x16x16xf32, #tpu.memory_space<vmem>>, vector<4x16x1xf32>
    %33 = vector.shape_cast %32 : vector<4x16x1xf32> to vector<4x16x1xf32>
    %34 = vector.broadcast %33 : vector<4x16x1xf32> to vector<4x16x2xf32>
    %c0_39 = arith.constant 0 : index
    %c0_40 = arith.constant 0 : index
    %c16 = arith.constant 16 : index
    %35 = vector.load %arg3[%c0_39, %c0_40, %c16] : memref<4x16x32xf32, #tpu.memory_space<vmem>>, vector<4x16x2xf32>
    tpu.vector_store %arg3[%c0_39, %c0_40, %c16], %34 {strides = array<i32>} : memref<4x16x32xf32, #tpu.memory_space<vmem>>, vector<4x16x2xf32>,
    %c0_41 = arith.constant 0 : index
    %c0_42 = arith.constant 0 : index
    %c9 = arith.constant 9 : index
    %36 = vector.load %arg1[%c0_41, %c0_42, %c9] : memref<4x16x16xf32, #tpu.memory_space<vmem>>, vector<4x16x1xf32>
    %37 = vector.shape_cast %36 : vector<4x16x1xf32> to vector<4x16x1xf32>
    %38 = vector.broadcast %37 : vector<4x16x1xf32> to vector<4x16x2xf32>
    %c0_43 = arith.constant 0 : index
    %c0_44 = arith.constant 0 : index
    %c18 = arith.constant 18 : index
    %39 = vector.load %arg3[%c0_43, %c0_44, %c18] : memref<4x16x32xf32, #tpu.memory_space<vmem>>, vector<4x16x2xf32>
    tpu.vector_store %arg3[%c0_43, %c0_44, %c18], %38 {strides = array<i32>} : memref<4x16x32xf32, #tpu.memory_space<vmem>>, vector<4x16x2xf32>,
    %c0_45 = arith.constant 0 : index
    %c0_46 = arith.constant 0 : index
    %c10_47 = arith.constant 10 : index
    %40 = vector.load %arg1[%c0_45, %c0_46, %c10_47] : memref<4x16x16xf32, #tpu.memory_space<vmem>>, vector<4x16x1xf32>
    %41 = vector.shape_cast %40 : vector<4x16x1xf32> to vector<4x16x1xf32>
    %42 = vector.broadcast %41 : vector<4x16x1xf32> to vector<4x16x2xf32>
    %c0_48 = arith.constant 0 : index
    %c0_49 = arith.constant 0 : index
    %c20 = arith.constant 20 : index
    %43 = vector.load %arg3[%c0_48, %c0_49, %c20] : memref<4x16x32xf32, #tpu.memory_space<vmem>>, vector<4x16x2xf32>
    tpu.vector_store %arg3[%c0_48, %c0_49, %c20], %42 {strides = array<i32>} : memref<4x16x32xf32, #tpu.memory_space<vmem>>, vector<4x16x2xf32>,
    %c0_50 = arith.constant 0 : index
    %c0_51 = arith.constant 0 : index
    %c11 = arith.constant 11 : index
    %44 = vector.load %arg1[%c0_50, %c0_51, %c11] : memref<4x16x16xf32, #tpu.memory_space<vmem>>, vector<4x16x1xf32>
    %45 = vector.shape_cast %44 : vector<4x16x1xf32> to vector<4x16x1xf32>
    %46 = vector.broadcast %45 : vector<4x16x1xf32> to vector<4x16x2xf32>
    %c0_52 = arith.constant 0 : index
    %c0_53 = arith.constant 0 : index
    %c22 = arith.constant 22 : index
    %47 = vector.load %arg3[%c0_52, %c0_53, %c22] : memref<4x16x32xf32, #tpu.memory_space<vmem>>, vector<4x16x2xf32>
    tpu.vector_store %arg3[%c0_52, %c0_53, %c22], %46 {strides = array<i32>} : memref<4x16x32xf32, #tpu.memory_space<vmem>>, vector<4x16x2xf32>,
    %c0_54 = arith.constant 0 : index
    %c0_55 = arith.constant 0 : index
    %c12_56 = arith.constant 12 : index
    %48 = vector.load %arg1[%c0_54, %c0_55, %c12_56] : memref<4x16x16xf32, #tpu.memory_space<vmem>>, vector<4x16x1xf32>
    %49 = vector.shape_cast %48 : vector<4x16x1xf32> to vector<4x16x1xf32>
    %50 = vector.broadcast %49 : vector<4x16x1xf32> to vector<4x16x2xf32>
    %c0_57 = arith.constant 0 : index
    %c0_58 = arith.constant 0 : index
    %c24 = arith.constant 24 : index
    %51 = vector.load %arg3[%c0_57, %c0_58, %c24] : memref<4x16x32xf32, #tpu.memory_space<vmem>>, vector<4x16x2xf32>
    tpu.vector_store %arg3[%c0_57, %c0_58, %c24], %50 {strides = array<i32>} : memref<4x16x32xf32, #tpu.memory_space<vmem>>, vector<4x16x2xf32>,
    %c0_59 = arith.constant 0 : index
    %c0_60 = arith.constant 0 : index
    %c13 = arith.constant 13 : index
    %52 = vector.load %arg1[%c0_59, %c0_60, %c13] : memref<4x16x16xf32, #tpu.memory_space<vmem>>, vector<4x16x1xf32>
    %53 = vector.shape_cast %52 : vector<4x16x1xf32> to vector<4x16x1xf32>
    %54 = vector.broadcast %53 : vector<4x16x1xf32> to vector<4x16x2xf32>
    %c0_61 = arith.constant 0 : index
    %c0_62 = arith.constant 0 : index
    %c26 = arith.constant 26 : index
    %55 = vector.load %arg3[%c0_61, %c0_62, %c26] : memref<4x16x32xf32, #tpu.memory_space<vmem>>, vector<4x16x2xf32>
    tpu.vector_store %arg3[%c0_61, %c0_62, %c26], %54 {strides = array<i32>} : memref<4x16x32xf32, #tpu.memory_space<vmem>>, vector<4x16x2xf32>,
    %c0_63 = arith.constant 0 : index
    %c0_64 = arith.constant 0 : index
    %c14_65 = arith.constant 14 : index
    %56 = vector.load %arg1[%c0_63, %c0_64, %c14_65] : memref<4x16x16xf32, #tpu.memory_space<vmem>>, vector<4x16x1xf32>
    %57 = vector.shape_cast %56 : vector<4x16x1xf32> to vector<4x16x1xf32>
    %58 = vector.broadcast %57 : vector<4x16x1xf32> to vector<4x16x2xf32>
    %c0_66 = arith.constant 0 : index
    %c0_67 = arith.constant 0 : index
    %c28 = arith.constant 28 : index
    %59 = vector.load %arg3[%c0_66, %c0_67, %c28] : memref<4x16x32xf32, #tpu.memory_space<vmem>>, vector<4x16x2xf32>
    tpu.vector_store %arg3[%c0_66, %c0_67, %c28], %58 {strides = array<i32>} : memref<4x16x32xf32, #tpu.memory_space<vmem>>, vector<4x16x2xf32>,
    %c0_68 = arith.constant 0 : index
    %c0_69 = arith.constant 0 : index
    %c15 = arith.constant 15 : index
    %60 = vector.load %arg1[%c0_68, %c0_69, %c15] : memref<4x16x16xf32, #tpu.memory_space<vmem>>, vector<4x16x1xf32>
    %61 = vector.shape_cast %60 : vector<4x16x1xf32> to vector<4x16x1xf32>
    %62 = vector.broadcast %61 : vector<4x16x1xf32> to vector<4x16x2xf32>
    %c0_70 = arith.constant 0 : index
    %c0_71 = arith.constant 0 : index
    %c30 = arith.constant 30 : index
    %63 = vector.load %arg3[%c0_70, %c0_71, %c30] : memref<4x16x32xf32, #tpu.memory_space<vmem>>, vector<4x16x2xf32>
    tpu.vector_store %arg3[%c0_70, %c0_71, %c30], %62 {strides = array<i32>} : memref<4x16x32xf32, #tpu.memory_space<vmem>>, vector<4x16x2xf32>,
    %c0_72 = arith.constant 0 : index
    %c0_73 = arith.constant 0 : index
    %c0_74 = arith.constant 0 : index
    %64 = vector.load %arg3[%c0_72, %c0_73, %c0_74] : memref<4x16x32xf32, #tpu.memory_space<vmem>>, vector<4x1x32xf32>
    %65 = vector.shape_cast %64 : vector<4x1x32xf32> to vector<4x1x32xf32>
    %66 = vector.broadcast %65 : vector<4x1x32xf32> to vector<4x2x32xf32>
    %c0_75 = arith.constant 0 : index
    %c0_76 = arith.constant 0 : index
    %c0_77 = arith.constant 0 : index
    %67 = vector.load %arg2[%c0_75, %c0_76, %c0_77] : memref<4x32x32xf32, #tpu.memory_space<vmem>>, vector<4x2x32xf32>
    tpu.vector_store %arg2[%c0_75, %c0_76, %c0_77], %66 {strides = array<i32>} : memref<4x32x32xf32, #tpu.memory_space<vmem>>, vector<4x2x32xf32>,
    %c0_78 = arith.constant 0 : index
    %c1_79 = arith.constant 1 : index
    %c0_80 = arith.constant 0 : index
    %68 = vector.load %arg3[%c0_78, %c1_79, %c0_80] : memref<4x16x32xf32, #tpu.memory_space<vmem>>, vector<4x1x32xf32>
    %69 = vector.shape_cast %68 : vector<4x1x32xf32> to vector<4x1x32xf32>
    %70 = vector.broadcast %69 : vector<4x1x32xf32> to vector<4x2x32xf32>
    %c0_81 = arith.constant 0 : index
    %c2_82 = arith.constant 2 : index
    %c0_83 = arith.constant 0 : index
    %71 = vector.load %arg2[%c0_81, %c2_82, %c0_83] : memref<4x32x32xf32, #tpu.memory_space<vmem>>, vector<4x2x32xf32>
    tpu.vector_store %arg2[%c0_81, %c2_82, %c0_83], %70 {strides = array<i32>} : memref<4x32x32xf32, #tpu.memory_space<vmem>>, vector<4x2x32xf32>,
    %c0_84 = arith.constant 0 : index
    %c2_85 = arith.constant 2 : index
    %c0_86 = arith.constant 0 : index
    %72 = vector.load %arg3[%c0_84, %c2_85, %c0_86] : memref<4x16x32xf32, #tpu.memory_space<vmem>>, vector<4x1x32xf32>
    %73 = vector.shape_cast %72 : vector<4x1x32xf32> to vector<4x1x32xf32>
    %74 = vector.broadcast %73 : vector<4x1x32xf32> to vector<4x2x32xf32>
    %c0_87 = arith.constant 0 : index
    %c4_88 = arith.constant 4 : index
    %c0_89 = arith.constant 0 : index
    %75 = vector.load %arg2[%c0_87, %c4_88, %c0_89] : memref<4x32x32xf32, #tpu.memory_space<vmem>>, vector<4x2x32xf32>
    tpu.vector_store %arg2[%c0_87, %c4_88, %c0_89], %74 {strides = array<i32>} : memref<4x32x32xf32, #tpu.memory_space<vmem>>, vector<4x2x32xf32>,
    %c0_90 = arith.constant 0 : index
    %c3_91 = arith.constant 3 : index
    %c0_92 = arith.constant 0 : index
    %76 = vector.load %arg3[%c0_90, %c3_91, %c0_92] : memref<4x16x32xf32, #tpu.memory_space<vmem>>, vector<4x1x32xf32>
    %77 = vector.shape_cast %76 : vector<4x1x32xf32> to vector<4x1x32xf32>
    %78 = vector.broadcast %77 : vector<4x1x32xf32> to vector<4x2x32xf32>
    %c0_93 = arith.constant 0 : index
    %c6_94 = arith.constant 6 : index
    %c0_95 = arith.constant 0 : index
    %79 = vector.load %arg2[%c0_93, %c6_94, %c0_95] : memref<4x32x32xf32, #tpu.memory_space<vmem>>, vector<4x2x32xf32>
    tpu.vector_store %arg2[%c0_93, %c6_94, %c0_95], %78 {strides = array<i32>} : memref<4x32x32xf32, #tpu.memory_space<vmem>>, vector<4x2x32xf32>,
    %c0_96 = arith.constant 0 : index
    %c4_97 = arith.constant 4 : index
    %c0_98 = arith.constant 0 : index
    %80 = vector.load %arg3[%c0_96, %c4_97, %c0_98] : memref<4x16x32xf32, #tpu.memory_space<vmem>>, vector<4x1x32xf32>
    %81 = vector.shape_cast %80 : vector<4x1x32xf32> to vector<4x1x32xf32>
    %82 = vector.broadcast %81 : vector<4x1x32xf32> to vector<4x2x32xf32>
    %c0_99 = arith.constant 0 : index
    %c8_100 = arith.constant 8 : index
    %c0_101 = arith.constant 0 : index
    %83 = vector.load %arg2[%c0_99, %c8_100, %c0_101] : memref<4x32x32xf32, #tpu.memory_space<vmem>>, vector<4x2x32xf32>
    tpu.vector_store %arg2[%c0_99, %c8_100, %c0_101], %82 {strides = array<i32>} : memref<4x32x32xf32, #tpu.memory_space<vmem>>, vector<4x2x32xf32>,
    %c0_102 = arith.constant 0 : index
    %c5_103 = arith.constant 5 : index
    %c0_104 = arith.constant 0 : index
    %84 = vector.load %arg3[%c0_102, %c5_103, %c0_104] : memref<4x16x32xf32, #tpu.memory_space<vmem>>, vector<4x1x32xf32>
    %85 = vector.shape_cast %84 : vector<4x1x32xf32> to vector<4x1x32xf32>
    %86 = vector.broadcast %85 : vector<4x1x32xf32> to vector<4x2x32xf32>
    %c0_105 = arith.constant 0 : index
    %c10_106 = arith.constant 10 : index
    %c0_107 = arith.constant 0 : index
    %87 = vector.load %arg2[%c0_105, %c10_106, %c0_107] : memref<4x32x32xf32, #tpu.memory_space<vmem>>, vector<4x2x32xf32>
    tpu.vector_store %arg2[%c0_105, %c10_106, %c0_107], %86 {strides = array<i32>} : memref<4x32x32xf32, #tpu.memory_space<vmem>>, vector<4x2x32xf32>,
    %c0_108 = arith.constant 0 : index
    %c6_109 = arith.constant 6 : index
    %c0_110 = arith.constant 0 : index
    %88 = vector.load %arg3[%c0_108, %c6_109, %c0_110] : memref<4x16x32xf32, #tpu.memory_space<vmem>>, vector<4x1x32xf32>
    %89 = vector.shape_cast %88 : vector<4x1x32xf32> to vector<4x1x32xf32>
    %90 = vector.broadcast %89 : vector<4x1x32xf32> to vector<4x2x32xf32>
    %c0_111 = arith.constant 0 : index
    %c12_112 = arith.constant 12 : index
    %c0_113 = arith.constant 0 : index
    %91 = vector.load %arg2[%c0_111, %c12_112, %c0_113] : memref<4x32x32xf32, #tpu.memory_space<vmem>>, vector<4x2x32xf32>
    tpu.vector_store %arg2[%c0_111, %c12_112, %c0_113], %90 {strides = array<i32>} : memref<4x32x32xf32, #tpu.memory_space<vmem>>, vector<4x2x32xf32>,
    %c0_114 = arith.constant 0 : index
    %c7_115 = arith.constant 7 : index
    %c0_116 = arith.constant 0 : index
    %92 = vector.load %arg3[%c0_114, %c7_115, %c0_116] : memref<4x16x32xf32, #tpu.memory_space<vmem>>, vector<4x1x32xf32>
    %93 = vector.shape_cast %92 : vector<4x1x32xf32> to vector<4x1x32xf32>
    %94 = vector.broadcast %93 : vector<4x1x32xf32> to vector<4x2x32xf32>
    %c0_117 = arith.constant 0 : index
    %c14_118 = arith.constant 14 : index
    %c0_119 = arith.constant 0 : index
    %95 = vector.load %arg2[%c0_117, %c14_118, %c0_119] : memref<4x32x32xf32, #tpu.memory_space<vmem>>, vector<4x2x32xf32>
    tpu.vector_store %arg2[%c0_117, %c14_118, %c0_119], %94 {strides = array<i32>} : memref<4x32x32xf32, #tpu.memory_space<vmem>>, vector<4x2x32xf32>,
    %c0_120 = arith.constant 0 : index
    %c8_121 = arith.constant 8 : index
    %c0_122 = arith.constant 0 : index
    %96 = vector.load %arg3[%c0_120, %c8_121, %c0_122] : memref<4x16x32xf32, #tpu.memory_space<vmem>>, vector<4x1x32xf32>
    %97 = vector.shape_cast %96 : vector<4x1x32xf32> to vector<4x1x32xf32>
    %98 = vector.broadcast %97 : vector<4x1x32xf32> to vector<4x2x32xf32>
    %c0_123 = arith.constant 0 : index
    %c16_124 = arith.constant 16 : index
    %c0_125 = arith.constant 0 : index
    %99 = vector.load %arg2[%c0_123, %c16_124, %c0_125] : memref<4x32x32xf32, #tpu.memory_space<vmem>>, vector<4x2x32xf32>
    tpu.vector_store %arg2[%c0_123, %c16_124, %c0_125], %98 {strides = array<i32>} : memref<4x32x32xf32, #tpu.memory_space<vmem>>, vector<4x2x32xf32>,
    %c0_126 = arith.constant 0 : index
    %c9_127 = arith.constant 9 : index
    %c0_128 = arith.constant 0 : index
    %100 = vector.load %arg3[%c0_126, %c9_127, %c0_128] : memref<4x16x32xf32, #tpu.memory_space<vmem>>, vector<4x1x32xf32>
    %101 = vector.shape_cast %100 : vector<4x1x32xf32> to vector<4x1x32xf32>
    %102 = vector.broadcast %101 : vector<4x1x32xf32> to vector<4x2x32xf32>
    %c0_129 = arith.constant 0 : index
    %c18_130 = arith.constant 18 : index
    %c0_131 = arith.constant 0 : index
    %103 = vector.load %arg2[%c0_129, %c18_130, %c0_131] : memref<4x32x32xf32, #tpu.memory_space<vmem>>, vector<4x2x32xf32>
    tpu.vector_store %arg2[%c0_129, %c18_130, %c0_131], %102 {strides = array<i32>} : memref<4x32x32xf32, #tpu.memory_space<vmem>>, vector<4x2x32xf32>,
    %c0_132 = arith.constant 0 : index
    %c10_133 = arith.constant 10 : index
    %c0_134 = arith.constant 0 : index
    %104 = vector.load %arg3[%c0_132, %c10_133, %c0_134] : memref<4x16x32xf32, #tpu.memory_space<vmem>>, vector<4x1x32xf32>
    %105 = vector.shape_cast %104 : vector<4x1x32xf32> to vector<4x1x32xf32>
    %106 = vector.broadcast %105 : vector<4x1x32xf32> to vector<4x2x32xf32>
    %c0_135 = arith.constant 0 : index
    %c20_136 = arith.constant 20 : index
    %c0_137 = arith.constant 0 : index
    %107 = vector.load %arg2[%c0_135, %c20_136, %c0_137] : memref<4x32x32xf32, #tpu.memory_space<vmem>>, vector<4x2x32xf32>
    tpu.vector_store %arg2[%c0_135, %c20_136, %c0_137], %106 {strides = array<i32>} : memref<4x32x32xf32, #tpu.memory_space<vmem>>, vector<4x2x32xf32>,
    %c0_138 = arith.constant 0 : index
    %c11_139 = arith.constant 11 : index
    %c0_140 = arith.constant 0 : index
    %108 = vector.load %arg3[%c0_138, %c11_139, %c0_140] : memref<4x16x32xf32, #tpu.memory_space<vmem>>, vector<4x1x32xf32>
    %109 = vector.shape_cast %108 : vector<4x1x32xf32> to vector<4x1x32xf32>
    %110 = vector.broadcast %109 : vector<4x1x32xf32> to vector<4x2x32xf32>
    %c0_141 = arith.constant 0 : index
    %c22_142 = arith.constant 22 : index
    %c0_143 = arith.constant 0 : index
    %111 = vector.load %arg2[%c0_141, %c22_142, %c0_143] : memref<4x32x32xf32, #tpu.memory_space<vmem>>, vector<4x2x32xf32>
    tpu.vector_store %arg2[%c0_141, %c22_142, %c0_143], %110 {strides = array<i32>} : memref<4x32x32xf32, #tpu.memory_space<vmem>>, vector<4x2x32xf32>,
    %c0_144 = arith.constant 0 : index
    %c12_145 = arith.constant 12 : index
    %c0_146 = arith.constant 0 : index
    %112 = vector.load %arg3[%c0_144, %c12_145, %c0_146] : memref<4x16x32xf32, #tpu.memory_space<vmem>>, vector<4x1x32xf32>
    %113 = vector.shape_cast %112 : vector<4x1x32xf32> to vector<4x1x32xf32>
    %114 = vector.broadcast %113 : vector<4x1x32xf32> to vector<4x2x32xf32>
    %c0_147 = arith.constant 0 : index
    %c24_148 = arith.constant 24 : index
    %c0_149 = arith.constant 0 : index
    %115 = vector.load %arg2[%c0_147, %c24_148, %c0_149] : memref<4x32x32xf32, #tpu.memory_space<vmem>>, vector<4x2x32xf32>
    tpu.vector_store %arg2[%c0_147, %c24_148, %c0_149], %114 {strides = array<i32>} : memref<4x32x32xf32, #tpu.memory_space<vmem>>, vector<4x2x32xf32>,
    %c0_150 = arith.constant 0 : index
    %c13_151 = arith.constant 13 : index
    %c0_152 = arith.constant 0 : index
    %116 = vector.load %arg3[%c0_150, %c13_151, %c0_152] : memref<4x16x32xf32, #tpu.memory_space<vmem>>, vector<4x1x32xf32>
    %117 = vector.shape_cast %116 : vector<4x1x32xf32> to vector<4x1x32xf32>
    %118 = vector.broadcast %117 : vector<4x1x32xf32> to vector<4x2x32xf32>
    %c0_153 = arith.constant 0 : index
    %c26_154 = arith.constant 26 : index
    %c0_155 = arith.constant 0 : index
    %119 = vector.load %arg2[%c0_153, %c26_154, %c0_155] : memref<4x32x32xf32, #tpu.memory_space<vmem>>, vector<4x2x32xf32>
    tpu.vector_store %arg2[%c0_153, %c26_154, %c0_155], %118 {strides = array<i32>} : memref<4x32x32xf32, #tpu.memory_space<vmem>>, vector<4x2x32xf32>,
    %c0_156 = arith.constant 0 : index
    %c14_157 = arith.constant 14 : index
    %c0_158 = arith.constant 0 : index
    %120 = vector.load %arg3[%c0_156, %c14_157, %c0_158] : memref<4x16x32xf32, #tpu.memory_space<vmem>>, vector<4x1x32xf32>
    %121 = vector.shape_cast %120 : vector<4x1x32xf32> to vector<4x1x32xf32>
    %122 = vector.broadcast %121 : vector<4x1x32xf32> to vector<4x2x32xf32>
    %c0_159 = arith.constant 0 : index
    %c28_160 = arith.constant 28 : index
    %c0_161 = arith.constant 0 : index
    %123 = vector.load %arg2[%c0_159, %c28_160, %c0_161] : memref<4x32x32xf32, #tpu.memory_space<vmem>>, vector<4x2x32xf32>
    tpu.vector_store %arg2[%c0_159, %c28_160, %c0_161], %122 {strides = array<i32>} : memref<4x32x32xf32, #tpu.memory_space<vmem>>, vector<4x2x32xf32>,
    %c0_162 = arith.constant 0 : index
    %c15_163 = arith.constant 15 : index
    %c0_164 = arith.constant 0 : index
    %124 = vector.load %arg3[%c0_162, %c15_163, %c0_164] : memref<4x16x32xf32, #tpu.memory_space<vmem>>, vector<4x1x32xf32>
    %125 = vector.shape_cast %124 : vector<4x1x32xf32> to vector<4x1x32xf32>
    %126 = vector.broadcast %125 : vector<4x1x32xf32> to vector<4x2x32xf32>
    %c0_165 = arith.constant 0 : index
    %c30_166 = arith.constant 30 : index
    %c0_167 = arith.constant 0 : index
    %127 = vector.load %arg2[%c0_165, %c30_166, %c0_167] : memref<4x32x32xf32, #tpu.memory_space<vmem>>, vector<4x2x32xf32>
    tpu.vector_store %arg2[%c0_165, %c30_166, %c0_167], %126 {strides = array<i32>} : memref<4x32x32xf32, #tpu.memory_space<vmem>>, vector<4x2x32xf32>,
    return
  }
  func.func @transform_0(%arg0: i32) -> (i32, i32, i32) {
    %c0_i32 = arith.constant 0 : i32
    %c0_i32_0 = arith.constant 0 : i32
    %c0_i32_1 = arith.constant 0 : i32
    return %arg0, %c0_i32, %c0_i32_0 : i32, i32, i32
  }
  func.func @transform_1(%arg0: i32) -> (i32, i32, i32) {
    %c0_i32 = arith.constant 0 : i32
    %c0_i32_0 = arith.constant 0 : i32
    %c0_i32_1 = arith.constant 0 : i32
    return %arg0, %c0_i32, %c0_i32_0 : i32, i32, i32
  }
}

</mosaic_0001>

<bundles_post_ra>
// kernel: tpu_custom_call.1
= control target key start
LH: loop header
LB: loop body
LE: loop exit
PB: predicated region body
PF: predicated region fallthrough
CT: control target
= control target key end

     0   :  { %6 = vsyncpa [#allocation4], 0  ;;  %s2411_s0 = inlined_call_operand.hbm [shape: f32[8,16,16], index: 0, kind: input, shape index: {}]   ;;  %s2412_s1 = inlined_call_operand.hbm [shape: f32[8,32,32], index: 1, kind: output, shape index: {}]  }
   0x1   :  { %8 = vsyncpa [#allocation4 + $0x1], 0 }
   0x2   :  { %9 = vsyncpa [#allocation5], 0 }
   0x3   :  { %11 = vsyncpa [#allocation5 + $0x1], 0  ;;  %s1835_s6 = smov 0   ;;  %s1837_s7 = smov 0  }
   0x4   :  { %s1839_s8 = smov 0   ;;  %s1841_s9 = smov 0  }
   0x5 LB: > { %s1856_s10 = sadd.s32 4294967295, %s1801_s9   ;;  %s1523_s11 = sadd.s32 4294967294, %s1801_s9   ;;  %s1801_s9 = sphi %s1841_s9, %s2425_s9   ;;  %s1797_s8 = sphi %s1839_s8, %s2424_s8   ;;  %s1793_s7 = sphi %s1837_s7, %s2423_s7   ;;  %s1789_s6 = sphi %s1835_s6, %s2422_s6  }
   0x6   : > { %s1860_s12 = sadd.s32 1, %s1801_s9   ;;  %s24_s13 = sadd.s32 1, %s1797_s8 }
   0x7   : > { %s21_s14 = ssub.s32 %s1801_s9, %s1860_s12  ;;  %p31_p0 = scmp.ne.s32.totalorder %s1797_s8, %s1793_s7 }
   0x8   : > { %p22_p1 = scmp.eq.s32.totalorder %s21_s14, 0  ;;  %p32_p2 = scmp.eq.s32.totalorder %s1801_s9, 0 }
   0x9   : > { %p37_p3 = scmp.ne.s32.totalorder %s1793_s7, %s1789_s6  ;;  %p38_p4 = scmp.eq.s32.totalorder %s1856_s10, 0 }
   0xa   : > { %s1872_s15 = scalar_select %p22_p1, %s1797_s8, %s24_s13  }
   0xb   : > { %p1874_p5 = por %p32_p2, %p31_p0  ;;  %p1878_p6 = por %p38_p4, %p37_p3 }
   0xc   : > { %p61_p7 = scmp.eq.s32.totalorder %s1856_s10, 1  ;;  %p67_p8 = scmp.eq.s32.totalorder %s1523_s11, 1 }
   0xd   : > { %p1619_p10 = scmp.lt.s32.totalorder %s1801_s9, 2  ;;  %s87_s20 = sand.u32 1, %s1797_s8  }
   0xe   : > { %p1885_p11 = por %p61_p7, %p31_p0  ;;  %p1889_p12 = por %p67_p8, %p37_p3 }
   0xf   : > { %s1604_s21 = sshll.u32 %s1801_s9, 10  ;;  %s1526_s22 = sshll.u32 %s87_s20, 6 }
  0x10   : > { %s2416_s18 = scalar_select %p1885_p11, 1, 0 }
  0x11   : > { %s2417_s19 = scalar_select %p1889_p12, 1, 0 }
  0x12   : > { %s1898_s25 = scalar_lea.hbm %s2411_s0, %s1604_s21  ;;  %s91_s26 = scalar_lea.vmem [#allocation3], %s1526_s22 }
  0x13   : > { %s99_s27 = sshll.u32 %s91_s26, 4  ;;  %p1902_p13 = pnand %p1619_p10, %p1874_p5  ;;  %s1906_s27 = int_to_ptr.vmem [resolvable:$true] %s99_s27 }
  0x14   : > { %s1908_s29 = scalar_lea.sflag [#allocation4], %s87_s20  ;;  %s1705_s30 = scalar_lea.hbm %s1898_s25, 1024 }
  0x15   : > { %p1706_p0 = scmp.ne.s32.totalorder %s1898_s25, %s1705_s30  ;;  %p1707_p1 = pneg %p1902_p13 }
  0x16   : > { %s1710_s4 = scalar_lea.hbm %s2411_s0, 2048  ;;  %p1711_p4 = scmp.lt.u32.totalorder %s1898_s25, %s2411_s0 }
  0x17   : > { %p1708_p2 = pnand %p1707_p1, %p1706_p0  ;;  %p1712_p5 = scmp.lt.u32.totalorder %s1710_s4, %s1705_s30 }
  0x18   : > { %p1714_p8 = scmp.lt.u32.totalorder %s1705_s30, %s1898_s25 }
  0x19   : > { %p1709_p3 = pneg %p1708_p2  ;;  %p1713_p7 = por %p1712_p5, %p1711_p4 }
  0x1b   : > { %p1715_p10 = por %p1714_p8, %p1713_p7 }
  0x1d   : > { %p1716_p9 = pnand %p1715_p10, %p1709_p3 }
  0x1f   : > { %1719 = shalt.err (!%p1716_p9)
}
  0x20   : > { %s1720_s13 = scalar_lea.vmem %s1906_s27, 1024  ;;  %s1803_s14 = smov [#allocation3]  }
  0x21   : > { %p1721_p0 = scmp.ne.s32.totalorder %s1906_s27, %s1720_s13  ;;  %s1725_s16 = sshll.u32 %s1803_s14, 4  ;;  %s1726_s16 = int_to_ptr.vmem [resolvable:$false] %s1725_s16 }
  0x22   : > { %s1727_s20 = scalar_lea.vmem %s1726_s16, 2048  ;;  %p1728_p11 = scmp.lt.s32.totalorder %s1906_s27, %s1726_s16 }
  0x23   : > { %p1723_p2 = pnand %p1721_p0, %p1707_p1  ;;  %p1729_p4 = scmp.lt.s32.totalorder %s1727_s20, %s1720_s13 }
  0x25   : > { %p1724_p12 = pneg %p1723_p2  ;;  %p1730_p5 = por %p1729_p4, %p1728_p11 }
  0x27   : > { %p1731_p7 = pnand %p1730_p5, %p1724_p12 }
  0x29   : > { %1734 = shalt.err (!%p1731_p7)
}
  0x2a   : > { %s1804_s21 = smov 128   ;;  %s1805_s22 = smov 8  }
  0x2b   : > { %1614 = dma.hbm_to_vmem [thread:$0]  (!%p1902_p13), %s1898_s25, 1024, %s1906_s27, %s1908_s29, %s1804_s21, %s1804_s21, %s1805_s22  }
  0x2c   : > { %p1530_p9 = scmp.ge.s32.totalorder %s1801_s9, 1  ;;  %p107_p1 = scmp.lt.s32.totalorder %s1801_s9, 3 }
  0x2e   : > { %p108_p3 = pnand %p1530_p9, %p107_p1 }
  0x2f   : > { %s1939_s23 = sand.u32 (!%p108_p3), 1, %s1793_s7  }
  0x30   : > { %111 = sbr.rel (%p108_p3) target bundleno = 519 (0x207), region = 24  ;;  %s1531_s24 = sshll.u32 (!%p108_p3), %s1939_s23, 6 }
  0x31   : > { %s114_s26 = scalar_lea.sflag (!%p108_p3), [#allocation4], %s1939_s23  ;;  %s117_s30 = scalar_lea.vmem (!%p108_p3), [#allocation3], %s1531_s24 }
  0x37   : > { %1780 = dma.done.wait (%p1878_p6), %s114_s26, 1024  }
  0x38   : > { %1782 = vsyncadd (%p1878_p6), %s114_s26, 4294966272  ;;  %v1806_v0 = vmov 0   ;;  %v1947_v1 = vld [vmem:[%s117_s30 + $0x10] sm:$0xff]  ;;  %v1950_v2 = vld [vmem:[%s117_s30] sm:$0xff]  ;;  %v1807_v9 = vmov 1   ;;  %v1808_v10 = vmov 2  }
  0x39   : > { %1674 = vset.pattern.permute.xlu1 %v1806_v0  ;;  %1673 = vset.pattern.permute.xlu0 %v1806_v0  ;;  %v1952_v3 = vld [vmem:[%s117_s30 + $0x18] sm:$0xff]  ;;  %v1955_v4 = vld [vmem:[%s117_s30 + $0x8] sm:$0xff]  ;;  %v1961_v6 = vld [vmem:[%s117_s30 + $0x20] sm:$0xff]  ;;  %v1809_v11 = vmov 3   ;;  %v1810_v12 = vmov 4   ;;  %v1811_v13 = vmov 5  }
  0x3a   : > { %158 = vperm.xlu1 %1674, %v1947_v1   ;;  %148 = vperm.xlu0 %1673, %v1950_v2   ;;  %v1958_v5 = vld [vmem:[%s117_s30 + $0x28] sm:$0xff]  ;;  %v1964_v7 = vld [vmem:[%s117_s30 + $0x38] sm:$0xff]  ;;  %v1967_v8 = vld [vmem:[%s117_s30 + $0x30] sm:$0xff]  ;;  %v1812_v14 = vmov 6   ;;  %v1813_v15 = vmov 7   ;;  %v1814_v16 = vmov 8  }
  0x3b   : > { %vm186_vm0 = vcmask 15360   ;;  %v1815_v23 = vmov 9   ;;  %vm243_vm1 = vcmask 31760   ;;  %v1816_v32 = vmov 10   ;;  %s1532_s17 = sshll.u32 %s1939_s23, 7  ;;  %s1606_s27 = sshll.u32 %s1856_s10, 11 }
  0x3c   : > { %vm300_vm2 = vcmask 48160   ;;  %v1817_v39 = vmov 11   ;;  %vm357_vm3 = vcmask 64560   ;;  %v1818_v48 = vmov 12   ;;  %s2221_s25 = scalar_lea.vmem [#allocation6], %s1532_s17  ;;  %s2355_s2 = scalar_lea.hbm %s2412_s1, %s1606_s27 }
  0x3d   : > { %vm414_vm4 = vcmask 80960   ;;  %v1819_v55 = vmov 13   ;;  %vm471_vm5 = vcmask 97360   ;;  %v1820_v0 = vmov 14   ;;  %s1450_s10 = sshll.u32 %s2221_s25, 4  ;;  %s1436_s3 = scalar_lea.sflag [#allocation5], %s1939_s23  ;;  %s2357_s10 = int_to_ptr.vmem [resolvable:$true] %s1450_s10 }
  0x3e   : > { %163 = vperm.xlu1 %1674, %v1952_v3   ;;  %153 = vperm.xlu0 %1673, %v1955_v4   ;;  %vm528_vm6 = vcmask 113760   ;;  %vm585_vm7 = vcmask 130160   ;;  %vm642_vm8 = vcmask 146560   ;;  %vm699_vm9 = vcmask 162960   ;;  %s1735_s4 = scalar_lea.vmem %s2357_s10, 2048  ;;  %p2419_p11 = scmp.ne.s32.totalorder %s2416_s18, 0 }
  0x3f   : > { %vm756_vm10 = vcmask 179360   ;;  %vm813_vm11 = vcmask 195760   ;;  %vm870_vm12 = vcmask 212160   ;;  %vm927_vm13 = vcmask 228560   ;;  %p1736_p6 = scmp.ne.s32.totalorder %s2357_s10, %s1735_s4  ;;  %s1822_s5 = smov [#allocation6]  }
  0x40   : > { %vm984_vm14 = vcmask 244960   ;;  %vm1041_vm15 = vcmask 261360   ;;  %s1739_s11 = sshll.u32 %s1822_s5, 4  ;;  %s1740_s11 = int_to_ptr.vmem [resolvable:$false] %s1739_s11 }
  0x41   : > { %p1737_p12 = pnand %p1736_p6, %p2419_p11  ;;  %s1741_s13 = scalar_lea.vmem %s1740_s11, 4096 }
  0x42   : > { %173 = vperm.xlu1 %1674, %v1958_v5   ;;  %168 = vperm.xlu0 %1673, %v1961_v6   ;;  %p1742_p8 = scmp.lt.s32.totalorder %s2357_s10, %s1740_s11  ;;  %p1743_p10 = scmp.lt.s32.totalorder %s1741_s13, %s1735_s4 }
  0x43   : > { %p1738_p13 = pneg %p1737_p12 }
  0x44   : > { %p1744_p0 = por %p1743_p10, %p1742_p8 }
  0x46   : > { %183 = vperm.xlu1 %1674, %v1964_v7   ;;  %178 = vperm.xlu0 %1673, %v1967_v8   ;;  %p1745_p2 = pnand %p1744_p0, %p1738_p13 }
  0x4a   : > { %1676 = vset.pattern.permute.xlu1 %v1807_v9  ;;  %1675 = vset.pattern.permute.xlu0 %v1807_v9 }
  0x4b   : > { %210 = vperm.xlu1 %1676, %v1955_v4   ;;  %205 = vperm.xlu0 %1675, %v1950_v2  }
  0x4f   : > { %215 = vperm.xlu1 %1676, %v1947_v1   ;;  %220 = vperm.xlu0 %1675, %v1952_v3  }
  0x53   : > { %225 = vperm.xlu1 %1676, %v1961_v6   ;;  %230 = vperm.xlu0 %1675, %v1958_v5  }
  0x57   : > { %235 = vperm.xlu1 %1676, %v1967_v8   ;;  %240 = vperm.xlu0 %1675, %v1964_v7  }
  0x5b   : > { %1677 = vset.pattern.permute.xlu1 %v1808_v10  ;;  %1678 = vset.pattern.permute.xlu0 %v1808_v10 }
  0x5c   : > { %262 = vperm.xlu1 %1677, %v1950_v2   ;;  %267 = vperm.xlu0 %1678, %v1955_v4  }
  0x60   : > { %272 = vperm.xlu1 %1677, %v1947_v1   ;;  %282 = vperm.xlu0 %1678, %v1961_v6  }
  0x64   : > { %277 = vperm.xlu1 %1677, %v1952_v3   ;;  %292 = vperm.xlu0 %1678, %v1967_v8  }
  0x68   : > { %287 = vperm.xlu1 %1677, %v1958_v5   ;;  %1679 = vset.pattern.permute.xlu0 %v1809_v11 }
  0x69   : > { %319 = vperm.xlu0 %1679, %v1950_v2  }
  0x6c   : > { %297 = vperm.xlu1 %1677, %v1964_v7  }
  0x6d   : > { %334 = vperm.xlu0 %1679, %v1952_v3  }
  0x70   : > { %1680 = vset.pattern.permute.xlu1 %v1809_v11 }
  0x71   : > { %324 = vperm.xlu1 %1680, %v1955_v4   ;;  %344 = vperm.xlu0 %1679, %v1958_v5  }
  0x75   : > { %329 = vperm.xlu1 %1680, %v1947_v1   ;;  %354 = vperm.xlu0 %1679, %v1964_v7  }
  0x79   : > { %339 = vperm.xlu1 %1680, %v1961_v6   ;;  %1682 = vset.pattern.permute.xlu0 %v1810_v12 }
  0x7a   : > { %381 = vperm.xlu0 %1682, %v1955_v4  }
  0x7d   : > { %349 = vperm.xlu1 %1680, %v1967_v8  }
  0x7e   : > { %396 = vperm.xlu0 %1682, %v1961_v6  }
  0x81   : > { %1681 = vset.pattern.permute.xlu1 %v1810_v12 }
  0x82   : > { %376 = vperm.xlu1 %1681, %v1950_v2   ;;  %406 = vperm.xlu0 %1682, %v1967_v8  }
  0x86   : > { %386 = vperm.xlu1 %1681, %v1947_v1   ;;  %1683 = vset.pattern.permute.xlu0 %v1811_v13 }
  0x87   : > { %433 = vperm.xlu0 %1683, %v1950_v2  }
  0x8a   : > { %391 = vperm.xlu1 %1681, %v1952_v3  }
  0x8b   : > { %448 = vperm.xlu0 %1683, %v1952_v3  }
  0x8e   : > { %401 = vperm.xlu1 %1681, %v1958_v5  }
  0x8f   : > { %458 = vperm.xlu0 %1683, %v1958_v5  }
  0x92   : > { %411 = vperm.xlu1 %1681, %v1964_v7  }
  0x93   : > { %468 = vperm.xlu0 %1683, %v1964_v7  }
  0x96   : > { %1684 = vset.pattern.permute.xlu1 %v1811_v13 }
  0x97   : > { %438 = vperm.xlu1 %1684, %v1955_v4   ;;  %1686 = vset.pattern.permute.xlu0 %v1812_v14 }
  0x98   : > { %495 = vperm.xlu0 %1686, %v1955_v4  }
  0x9b   : > { %443 = vperm.xlu1 %1684, %v1947_v1  }
  0x9c   : > { %510 = vperm.xlu0 %1686, %v1961_v6  }
  0x9f   : > { %453 = vperm.xlu1 %1684, %v1961_v6  }
  0xa0   : > { %520 = vperm.xlu0 %1686, %v1967_v8  }
  0xa3   : > { %463 = vperm.xlu1 %1684, %v1967_v8  }
  0xa4   : > { %1687 = vset.pattern.permute.xlu0 %v1813_v15 }
  0xa5   : > { %547 = vperm.xlu0 %1687, %v1950_v2  }
  0xa7   : > { %1685 = vset.pattern.permute.xlu1 %v1812_v14 }
  0xa8   : > { %490 = vperm.xlu1 %1685, %v1950_v2  }
  0xa9   : > { %562 = vperm.xlu0 %1687, %v1952_v3  }
  0xac   : > { %500 = vperm.xlu1 %1685, %v1947_v1  }
  0xad   : > { %572 = vperm.xlu0 %1687, %v1958_v5  }
  0xb0   : > { %505 = vperm.xlu1 %1685, %v1952_v3  }
  0xb1   : > { %582 = vperm.xlu0 %1687, %v1964_v7  }
  0xb4   : > { %515 = vperm.xlu1 %1685, %v1958_v5  }
  0xb5   : > { %1690 = vset.pattern.permute.xlu0 %v1814_v16 }
  0xb6   : > { %609 = vperm.xlu0 %1690, %v1955_v4  }
  0xb8   : > { %525 = vperm.xlu1 %1685, %v1964_v7  }
  0xb9   : > { %v159_v17 = vpop.permute.xlu1 %158  ;;  %v149_v18 = vpop.permute.xlu0 %148 }
  0xba   : > { %189 = vst.msk [vmem:[#allocation2 + $0x10] sm:$0xff] %vm186_vm0, %v159_v17  ;;  %187 = vst.msk [vmem:[#allocation2] sm:$0xff] %vm186_vm0, %v149_v18  ;;  %624 = vperm.xlu0 %1690, %v1961_v6  }
  0xbc   : > { %1688 = vset.pattern.permute.xlu1 %v1813_v15  ;;  %v1821_v15 = vmov 15  }
  0xbd   : > { %552 = vperm.xlu1 %1688, %v1955_v4   ;;  %v164_v19 = vpop.permute.xlu1 %163  ;;  %v154_v20 = vpop.permute.xlu0 %153 }
  0xbe   : > { %190 = vst.msk [vmem:[#allocation2 + $0x18] sm:$0xff] %vm186_vm0, %v164_v19  ;;  %188 = vst.msk [vmem:[#allocation2 + $0x8] sm:$0xff] %vm186_vm0, %v154_v20  ;;  %634 = vperm.xlu0 %1690, %v1967_v8  }
  0xc1   : > { %557 = vperm.xlu1 %1688, %v1947_v1   ;;  %v174_v21 = vpop.permute.xlu1 %173  ;;  %v169_v22 = vpop.permute.xlu0 %168 }
  0xc2   : > { %192 = vst.msk [vmem:[#allocation2 + $0x28] sm:$0xff] %vm186_vm0, %v174_v21  ;;  %191 = vst.msk [vmem:[#allocation2 + $0x20] sm:$0xff] %vm186_vm0, %v169_v22  ;;  %1691 = vset.pattern.permute.xlu0 %v1815_v23 }
  0xc3   : > { %661 = vperm.xlu0 %1691, %v1950_v2  }
  0xc5   : > { %567 = vperm.xlu1 %1688, %v1961_v6   ;;  %v184_v24 = vpop.permute.xlu1 %183  ;;  %v179_v25 = vpop.permute.xlu0 %178 }
  0xc6   : > { %194 = vst.msk [vmem:[#allocation2 + $0x38] sm:$0xff] %vm186_vm0, %v184_v24  ;;  %193 = vst.msk [vmem:[#allocation2 + $0x30] sm:$0xff] %vm186_vm0, %v179_v25  ;;  %vm1070_vm0 = vcmask 254976  }
  0xc7   : > { %676 = vperm.xlu0 %1691, %v1952_v3  }
  0xc9   : > { %577 = vperm.xlu1 %1688, %v1967_v8  }
  0xca   : > { %v211_v26 = vpop.permute.xlu1 %210  ;;  %v206_v27 = vpop.permute.xlu0 %205 }
  0xcb   : > { %245 = vst.msk [vmem:[#allocation2 + $0x8] sm:$0xff] %vm243_vm1, %v211_v26  ;;  %244 = vst.msk [vmem:[#allocation2] sm:$0xff] %vm243_vm1, %v206_v27  ;;  %686 = vperm.xlu0 %1691, %v1958_v5  }
  0xcd   : > { %1689 = vset.pattern.permute.xlu1 %v1814_v16 }
  0xce   : > { %604 = vperm.xlu1 %1689, %v1950_v2   ;;  %v216_v28 = vpop.permute.xlu1 %215  ;;  %v221_v29 = vpop.permute.xlu0 %220 }
  0xcf   : > { %246 = vst.msk [vmem:[#allocation2 + $0x10] sm:$0xff] %vm243_vm1, %v216_v28  ;;  %247 = vst.msk [vmem:[#allocation2 + $0x18] sm:$0xff] %vm243_vm1, %v221_v29  ;;  %696 = vperm.xlu0 %1691, %v1964_v7  }
  0xd2   : > { %614 = vperm.xlu1 %1689, %v1947_v1   ;;  %v226_v30 = vpop.permute.xlu1 %225  ;;  %v231_v31 = vpop.permute.xlu0 %230 }
  0xd3   : > { %248 = vst.msk [vmem:[#allocation2 + $0x20] sm:$0xff] %vm243_vm1, %v226_v30  ;;  %249 = vst.msk [vmem:[#allocation2 + $0x28] sm:$0xff] %vm243_vm1, %v231_v31  ;;  %1694 = vset.pattern.permute.xlu0 %v1816_v32 }
  0xd4   : > { %723 = vperm.xlu0 %1694, %v1955_v4  }
  0xd6   : > { %619 = vperm.xlu1 %1689, %v1952_v3   ;;  %v236_v33 = vpop.permute.xlu1 %235  ;;  %v241_v34 = vpop.permute.xlu0 %240 }
  0xd7   : > { %250 = vst.msk [vmem:[#allocation2 + $0x30] sm:$0xff] %vm243_vm1, %v236_v33  ;;  %251 = vst.msk [vmem:[#allocation2 + $0x38] sm:$0xff] %vm243_vm1, %v241_v34 }
  0xd8   : > { %738 = vperm.xlu0 %1694, %v1961_v6  }
  0xda   : > { %629 = vperm.xlu1 %1689, %v1958_v5  }
  0xdb   : > { %v263_v35 = vpop.permute.xlu1 %262  ;;  %v268_v36 = vpop.permute.xlu0 %267 }
  0xdc   : > { %301 = vst.msk [vmem:[#allocation2] sm:$0xff] %vm300_vm2, %v263_v35  ;;  %302 = vst.msk [vmem:[#allocation2 + $0x8] sm:$0xff] %vm300_vm2, %v268_v36  ;;  %748 = vperm.xlu0 %1694, %v1967_v8  }
  0xde   : > { %639 = vperm.xlu1 %1689, %v1964_v7  }
  0xdf   : > { %v273_v37 = vpop.permute.xlu1 %272  ;;  %v283_v38 = vpop.permute.xlu0 %282 }
  0xe0   : > { %303 = vst.msk [vmem:[#allocation2 + $0x10] sm:$0xff] %vm300_vm2, %v273_v37  ;;  %305 = vst.msk [vmem:[#allocation2 + $0x20] sm:$0xff] %vm300_vm2, %v283_v38  ;;  %1695 = vset.pattern.permute.xlu0 %v1817_v39 }
  0xe1   : > { %775 = vperm.xlu0 %1695, %v1950_v2  }
  0xe2   : > { %1692 = vset.pattern.permute.xlu1 %v1815_v23 }
  0xe3   : > { %666 = vperm.xlu1 %1692, %v1955_v4   ;;  %v278_v40 = vpop.permute.xlu1 %277  ;;  %v293_v41 = vpop.permute.xlu0 %292 }
  0xe4   : > { %304 = vst.msk [vmem:[#allocation2 + $0x18] sm:$0xff] %vm300_vm2, %v278_v40  ;;  %307 = vst.msk [vmem:[#allocation2 + $0x30] sm:$0xff] %vm300_vm2, %v293_v41 }
  0xe5   : > { %790 = vperm.xlu0 %1695, %v1952_v3  }
  0xe7   : > { %671 = vperm.xlu1 %1692, %v1947_v1   ;;  %v288_v42 = vpop.permute.xlu1 %287 }
  0xe8   : > { %306 = vst.msk [vmem:[#allocation2 + $0x28] sm:$0xff] %vm300_vm2, %v288_v42  ;;  %v320_v43 = vpop.permute.xlu0 %319 }
  0xe9   : > { %358 = vst.msk [vmem:[#allocation2] sm:$0xff] %vm357_vm3, %v320_v43  ;;  %800 = vperm.xlu0 %1695, %v1958_v5  }
  0xeb   : > { %681 = vperm.xlu1 %1692, %v1961_v6   ;;  %v298_v44 = vpop.permute.xlu1 %297 }
  0xec   : > { %308 = vst.msk [vmem:[#allocation2 + $0x38] sm:$0xff] %vm300_vm2, %v298_v44  ;;  %v335_v45 = vpop.permute.xlu0 %334 }
  0xed   : > { %361 = vst.msk [vmem:[#allocation2 + $0x18] sm:$0xff] %vm357_vm3, %v335_v45  ;;  %810 = vperm.xlu0 %1695, %v1964_v7  }
  0xef   : > { %691 = vperm.xlu1 %1692, %v1967_v8  }
  0xf0   : > { %v325_v46 = vpop.permute.xlu1 %324  ;;  %v345_v47 = vpop.permute.xlu0 %344 }
  0xf1   : > { %359 = vst.msk [vmem:[#allocation2 + $0x8] sm:$0xff] %vm357_vm3, %v325_v46  ;;  %363 = vst.msk [vmem:[#allocation2 + $0x28] sm:$0xff] %vm357_vm3, %v345_v47  ;;  %1698 = vset.pattern.permute.xlu0 %v1818_v48 }
  0xf2   : > { %837 = vperm.xlu0 %1698, %v1955_v4  }
  0xf3   : > { %1693 = vset.pattern.permute.xlu1 %v1816_v32 }
  0xf4   : > { %718 = vperm.xlu1 %1693, %v1950_v2   ;;  %v330_v49 = vpop.permute.xlu1 %329  ;;  %v355_v50 = vpop.permute.xlu0 %354 }
  0xf5   : > { %360 = vst.msk [vmem:[#allocation2 + $0x10] sm:$0xff] %vm357_vm3, %v330_v49  ;;  %365 = vst.msk [vmem:[#allocation2 + $0x38] sm:$0xff] %vm357_vm3, %v355_v50 }
  0xf6   : > { %852 = vperm.xlu0 %1698, %v1961_v6  }
  0xf8   : > { %728 = vperm.xlu1 %1693, %v1947_v1   ;;  %v340_v51 = vpop.permute.xlu1 %339 }
  0xf9   : > { %362 = vst.msk [vmem:[#allocation2 + $0x20] sm:$0xff] %vm357_vm3, %v340_v51  ;;  %v382_v52 = vpop.permute.xlu0 %381 }
  0xfa   : > { %416 = vst.msk [vmem:[#allocation2 + $0x8] sm:$0xff] %vm414_vm4, %v382_v52  ;;  %862 = vperm.xlu0 %1698, %v1967_v8  }
  0xfc   : > { %733 = vperm.xlu1 %1693, %v1952_v3   ;;  %v350_v53 = vpop.permute.xlu1 %349 }
  0xfd   : > { %364 = vst.msk [vmem:[#allocation2 + $0x30] sm:$0xff] %vm357_vm3, %v350_v53  ;;  %v397_v54 = vpop.permute.xlu0 %396 }
  0xfe   : > { %419 = vst.msk [vmem:[#allocation2 + $0x20] sm:$0xff] %vm414_vm4, %v397_v54  ;;  %1699 = vset.pattern.permute.xlu0 %v1819_v55 }
  0xff   : > { %889 = vperm.xlu0 %1699, %v1950_v2  }
 0x100   : > { %743 = vperm.xlu1 %1693, %v1958_v5  }
 0x101   : > { %v377_v56 = vpop.permute.xlu1 %376  ;;  %v407_v57 = vpop.permute.xlu0 %406 }
 0x102   : > { %415 = vst.msk [vmem:[#allocation2] sm:$0xff] %vm414_vm4, %v377_v56  ;;  %421 = vst.msk [vmem:[#allocation2 + $0x30] sm:$0xff] %vm414_vm4, %v407_v57 }
 0x103   : > { %904 = vperm.xlu0 %1699, %v1952_v3  }
 0x104   : > { %753 = vperm.xlu1 %1693, %v1964_v7  }
 0x105   : > { %v387_v58 = vpop.permute.xlu1 %386 }
 0x106   : > { %417 = vst.msk [vmem:[#allocation2 + $0x10] sm:$0xff] %vm414_vm4, %v387_v58  ;;  %v434_v59 = vpop.permute.xlu0 %433 }
 0x107   : > { %472 = vst.msk [vmem:[#allocation2] sm:$0xff] %vm471_vm5, %v434_v59  ;;  %914 = vperm.xlu0 %1699, %v1958_v5  }
 0x108   : > { %1696 = vset.pattern.permute.xlu1 %v1817_v39 }
 0x109   : > { %780 = vperm.xlu1 %1696, %v1955_v4   ;;  %v392_v60 = vpop.permute.xlu1 %391 }
 0x10a   : > { %418 = vst.msk [vmem:[#allocation2 + $0x18] sm:$0xff] %vm414_vm4, %v392_v60  ;;  %v449_v61 = vpop.permute.xlu0 %448 }
 0x10b   : > { %475 = vst.msk [vmem:[#allocation2 + $0x18] sm:$0xff] %vm471_vm5, %v449_v61  ;;  %924 = vperm.xlu0 %1699, %v1964_v7  }
 0x10d   : > { %785 = vperm.xlu1 %1696, %v1947_v1   ;;  %v402_v62 = vpop.permute.xlu1 %401 }
 0x10e   : > { %420 = vst.msk [vmem:[#allocation2 + $0x28] sm:$0xff] %vm414_vm4, %v402_v62  ;;  %v459_v63 = vpop.permute.xlu0 %458 }
 0x10f   : > { %477 = vst.msk [vmem:[#allocation2 + $0x28] sm:$0xff] %vm471_vm5, %v459_v63  ;;  %1702 = vset.pattern.permute.xlu0 %v1820_v0 }
 0x110   : > { %951 = vperm.xlu0 %1702, %v1955_v4  }
 0x111   : > { %795 = vperm.xlu1 %1696, %v1961_v6   ;;  %v412_v9 = vpop.permute.xlu1 %411 }
 0x112   : > { %422 = vst.msk [vmem:[#allocation2 + $0x38] sm:$0xff] %vm414_vm4, %v412_v9  ;;  %v469_v10 = vpop.permute.xlu0 %468 }
 0x113   : > { %479 = vst.msk [vmem:[#allocation2 + $0x38] sm:$0xff] %vm471_vm5, %v469_v10 }
 0x114   : > { %966 = vperm.xlu0 %1702, %v1961_v6  }
 0x115   : > { %805 = vperm.xlu1 %1696, %v1967_v8  }
 0x116   : > { %v439_v11 = vpop.permute.xlu1 %438 }
 0x117   : > { %473 = vst.msk [vmem:[#allocation2 + $0x8] sm:$0xff] %vm471_vm5, %v439_v11  ;;  %v496_v12 = vpop.permute.xlu0 %495 }
 0x118   : > { %530 = vst.msk [vmem:[#allocation2 + $0x8] sm:$0xff] %vm528_vm6, %v496_v12  ;;  %976 = vperm.xlu0 %1702, %v1967_v8  }
 0x119   : > { %1697 = vset.pattern.permute.xlu1 %v1818_v48 }
 0x11a   : > { %832 = vperm.xlu1 %1697, %v1950_v2   ;;  %v444_v13 = vpop.permute.xlu1 %443 }
 0x11b   : > { %474 = vst.msk [vmem:[#allocation2 + $0x10] sm:$0xff] %vm471_vm5, %v444_v13  ;;  %v511_v14 = vpop.permute.xlu0 %510 }
 0x11c   : > { %1703 = vset.pattern.permute.xlu0 %v1821_v15 }
 0x11d   : > { %1003 = vperm.xlu0 %1703, %v1950_v2  }
 0x11e   : > { %842 = vperm.xlu1 %1697, %v1947_v1   ;;  %v454_v16 = vpop.permute.xlu1 %453 }
 0x11f   : > { %476 = vst.msk [vmem:[#allocation2 + $0x20] sm:$0xff] %vm471_vm5, %v454_v16  ;;  %v521_v17 = vpop.permute.xlu0 %520 }
 0x120   : > { %533 = vst.msk [vmem:[#allocation2 + $0x20] sm:$0xff] %vm528_vm6, %v511_v14 }
 0x121   : > { %1018 = vperm.xlu0 %1703, %v1952_v3  }
 0x122   : > { %847 = vperm.xlu1 %1697, %v1952_v3   ;;  %v464_v18 = vpop.permute.xlu1 %463 }
 0x123   : > { %478 = vst.msk [vmem:[#allocation2 + $0x30] sm:$0xff] %vm471_vm5, %v464_v18 }
 0x124   : > { %535 = vst.msk [vmem:[#allocation2 + $0x30] sm:$0xff] %vm528_vm6, %v521_v17  ;;  %v548_v19 = vpop.permute.xlu0 %547 }
 0x125   : > { %1028 = vperm.xlu0 %1703, %v1958_v5  }
 0x126   : > { %857 = vperm.xlu1 %1697, %v1958_v5  }
 0x127   : > { %v491_v20 = vpop.permute.xlu1 %490 }
 0x128   : > { %529 = vst.msk [vmem:[#allocation2] sm:$0xff] %vm528_vm6, %v491_v20  ;;  %v563_v21 = vpop.permute.xlu0 %562 }
 0x129   : > { %586 = vst.msk [vmem:[#allocation2] sm:$0xff] %vm585_vm7, %v548_v19  ;;  %1038 = vperm.xlu0 %1703, %v1964_v7  }
 0x12a   : > { %867 = vperm.xlu1 %1697, %v1964_v7  }
 0x12b   : > { %v501_v22 = vpop.permute.xlu1 %500 }
 0x12c   : > { %531 = vst.msk [vmem:[#allocation2 + $0x10] sm:$0xff] %vm528_vm6, %v501_v22  ;;  %v573_v23 = vpop.permute.xlu0 %572 }
 0x12e   : > { %1700 = vset.pattern.permute.xlu1 %v1819_v55 }
 0x12f   : > { %894 = vperm.xlu1 %1700, %v1955_v4   ;;  %v506_v24 = vpop.permute.xlu1 %505 }
 0x130   : > { %532 = vst.msk [vmem:[#allocation2 + $0x18] sm:$0xff] %vm528_vm6, %v506_v24  ;;  %v583_v25 = vpop.permute.xlu0 %582 }
 0x131   : > { %589 = vst.msk [vmem:[#allocation2 + $0x18] sm:$0xff] %vm585_vm7, %v563_v21 }
 0x133   : > { %899 = vperm.xlu1 %1700, %v1947_v1   ;;  %v516_v26 = vpop.permute.xlu1 %515 }
 0x134   : > { %534 = vst.msk [vmem:[#allocation2 + $0x28] sm:$0xff] %vm528_vm6, %v516_v26 }
 0x135   : > { %591 = vst.msk [vmem:[#allocation2 + $0x28] sm:$0xff] %vm585_vm7, %v573_v23  ;;  %v610_v27 = vpop.permute.xlu0 %609 }
 0x137   : > { %909 = vperm.xlu1 %1700, %v1961_v6   ;;  %v526_v28 = vpop.permute.xlu1 %525 }
 0x138   : > { %536 = vst.msk [vmem:[#allocation2 + $0x38] sm:$0xff] %vm528_vm6, %v526_v28 }
 0x139   : > { %593 = vst.msk [vmem:[#allocation2 + $0x38] sm:$0xff] %vm585_vm7, %v583_v25  ;;  %v625_v29 = vpop.permute.xlu0 %624 }
 0x13b   : > { %919 = vperm.xlu1 %1700, %v1967_v8  }
 0x13c   : > { %v553_v30 = vpop.permute.xlu1 %552 }
 0x13d   : > { %587 = vst.msk [vmem:[#allocation2 + $0x8] sm:$0xff] %vm585_vm7, %v553_v30  ;;  %v635_v31 = vpop.permute.xlu0 %634 }
 0x13e   : > { %644 = vst.msk [vmem:[#allocation2 + $0x8] sm:$0xff] %vm642_vm8, %v610_v27 }
 0x13f   : > { %1701 = vset.pattern.permute.xlu1 %v1820_v0 }
 0x140   : > { %946 = vperm.xlu1 %1701, %v1950_v2   ;;  %v558_v32 = vpop.permute.xlu1 %557 }
 0x141   : > { %588 = vst.msk [vmem:[#allocation2 + $0x10] sm:$0xff] %vm585_vm7, %v558_v32 }
 0x142   : > { %v662_v34 = vpop.permute.xlu0 %661 }
 0x144   : > { %956 = vperm.xlu1 %1701, %v1947_v1   ;;  %v568_v33 = vpop.permute.xlu1 %567 }
 0x145   : > { %590 = vst.msk [vmem:[#allocation2 + $0x20] sm:$0xff] %vm585_vm7, %v568_v33 }
 0x146   : > { %647 = vst.msk [vmem:[#allocation2 + $0x20] sm:$0xff] %vm642_vm8, %v625_v29  ;;  %v677_v36 = vpop.permute.xlu0 %676 }
 0x148   : > { %961 = vperm.xlu1 %1701, %v1952_v3   ;;  %v578_v35 = vpop.permute.xlu1 %577 }
 0x149   : > { %592 = vst.msk [vmem:[#allocation2 + $0x30] sm:$0xff] %vm585_vm7, %v578_v35 }
 0x14a   : > { %649 = vst.msk [vmem:[#allocation2 + $0x30] sm:$0xff] %vm642_vm8, %v635_v31  ;;  %v687_v37 = vpop.permute.xlu0 %686 }
 0x14c   : > { %971 = vperm.xlu1 %1701, %v1958_v5  }
 0x14d   : > { %v605_v2 = vpop.permute.xlu1 %604 }
 0x14e   : > { %643 = vst.msk [vmem:[#allocation2] sm:$0xff] %vm642_vm8, %v605_v2  ;;  %v697_v5 = vpop.permute.xlu0 %696 }
 0x14f   : > { %700 = vst.msk [vmem:[#allocation2] sm:$0xff] %vm699_vm9, %v662_v34 }
 0x150   : > { %981 = vperm.xlu1 %1701, %v1964_v7  }
 0x151   : > { %v615_v38 = vpop.permute.xlu1 %614 }
 0x152   : > { %645 = vst.msk [vmem:[#allocation2 + $0x10] sm:$0xff] %vm642_vm8, %v615_v38 }
 0x153   : > { %v724_v7 = vpop.permute.xlu0 %723 }
 0x154   : > { %1704 = vset.pattern.permute.xlu1 %v1821_v15 }
 0x155   : > { %1008 = vperm.xlu1 %1704, %v1955_v4   ;;  %v620_v3 = vpop.permute.xlu1 %619 }
 0x156   : > { %646 = vst.msk [vmem:[#allocation2 + $0x18] sm:$0xff] %vm642_vm8, %v620_v3 }
 0x157   : > { %703 = vst.msk [vmem:[#allocation2 + $0x18] sm:$0xff] %vm699_vm9, %v677_v36  ;;  %v739_v4 = vpop.permute.xlu0 %738 }
 0x159   : > { %1013 = vperm.xlu1 %1704, %v1947_v1   ;;  %v630_v39 = vpop.permute.xlu1 %629 }
 0x15a   : > { %648 = vst.msk [vmem:[#allocation2 + $0x28] sm:$0xff] %vm642_vm8, %v630_v39 }
 0x15b   : > { %705 = vst.msk [vmem:[#allocation2 + $0x28] sm:$0xff] %vm699_vm9, %v687_v37  ;;  %v749_v42 = vpop.permute.xlu0 %748 }
 0x15d   : > { %1023 = vperm.xlu1 %1704, %v1961_v6   ;;  %v640_v40 = vpop.permute.xlu1 %639 }
 0x15e   : > { %650 = vst.msk [vmem:[#allocation2 + $0x38] sm:$0xff] %vm642_vm8, %v640_v40 }
 0x15f   : > { %707 = vst.msk [vmem:[#allocation2 + $0x38] sm:$0xff] %vm699_vm9, %v697_v5 }
 0x160   : > { %v776_v6 = vpop.permute.xlu0 %775 }
 0x161   : > { %1033 = vperm.xlu1 %1704, %v1967_v8  }
 0x162   : > { %v667_v41 = vpop.permute.xlu1 %666 }
 0x163   : > { %701 = vst.msk [vmem:[#allocation2 + $0x8] sm:$0xff] %vm699_vm9, %v667_v41 }
 0x164   : > { %758 = vst.msk [vmem:[#allocation2 + $0x8] sm:$0xff] %vm756_vm10, %v724_v7  ;;  %v791_v8 = vpop.permute.xlu0 %790 }
 0x166   : > { %v672_v1 = vpop.permute.xlu1 %671 }
 0x167   : > { %702 = vst.msk [vmem:[#allocation2 + $0x10] sm:$0xff] %vm699_vm9, %v672_v1 }
 0x168   : > { %v801_v47 = vpop.permute.xlu0 %800 }
 0x16a   : > { %v682_v43 = vpop.permute.xlu1 %681 }
 0x16b   : > { %704 = vst.msk [vmem:[#allocation2 + $0x20] sm:$0xff] %vm699_vm9, %v682_v43 }
 0x16c   : > { %761 = vst.msk [vmem:[#allocation2 + $0x20] sm:$0xff] %vm756_vm10, %v739_v4  ;;  %v811_v49 = vpop.permute.xlu0 %810 }
 0x16e   : > { %v692_v44 = vpop.permute.xlu1 %691 }
 0x16f   : > { %706 = vst.msk [vmem:[#allocation2 + $0x30] sm:$0xff] %vm699_vm9, %v692_v44 }
 0x170   : > { %763 = vst.msk [vmem:[#allocation2 + $0x30] sm:$0xff] %vm756_vm10, %v749_v42 }
 0x171   : > { %v838_v51 = vpop.permute.xlu0 %837 }
 0x173   : > { %v719_v45 = vpop.permute.xlu1 %718 }
 0x174   : > { %757 = vst.msk [vmem:[#allocation2] sm:$0xff] %vm756_vm10, %v719_v45 }
 0x175   : > { %814 = vst.msk [vmem:[#allocation2] sm:$0xff] %vm813_vm11, %v776_v6  ;;  %v853_v54 = vpop.permute.xlu0 %852 }
 0x177   : > { %v729_v46 = vpop.permute.xlu1 %728 }
 0x178   : > { %759 = vst.msk [vmem:[#allocation2 + $0x10] sm:$0xff] %vm756_vm10, %v729_v46 }
 0x179   : > { %v863_v56 = vpop.permute.xlu0 %862 }
 0x17b   : > { %v734_v48 = vpop.permute.xlu1 %733 }
 0x17c   : > { %760 = vst.msk [vmem:[#allocation2 + $0x18] sm:$0xff] %vm756_vm10, %v734_v48 }
 0x17d   : > { %817 = vst.msk [vmem:[#allocation2 + $0x18] sm:$0xff] %vm813_vm11, %v791_v8 }
 0x17e   : > { %v890_v59 = vpop.permute.xlu0 %889 }
 0x17f   : > { %v744_v50 = vpop.permute.xlu1 %743 }
 0x180   : > { %762 = vst.msk [vmem:[#allocation2 + $0x28] sm:$0xff] %vm756_vm10, %v744_v50 }
 0x181   : > { %819 = vst.msk [vmem:[#allocation2 + $0x28] sm:$0xff] %vm813_vm11, %v801_v47 }
 0x182   : > { %v905_v61 = vpop.permute.xlu0 %904 }
 0x183   : > { %v754_v52 = vpop.permute.xlu1 %753 }
 0x184   : > { %764 = vst.msk [vmem:[#allocation2 + $0x38] sm:$0xff] %vm756_vm10, %v754_v52 }
 0x185   : > { %821 = vst.msk [vmem:[#allocation2 + $0x38] sm:$0xff] %vm813_vm11, %v811_v49 }
 0x186   : > { %v915_v63 = vpop.permute.xlu0 %914 }
 0x188   : > { %v781_v53 = vpop.permute.xlu1 %780 }
 0x189   : > { %815 = vst.msk [vmem:[#allocation2 + $0x8] sm:$0xff] %vm813_vm11, %v781_v53 }
 0x18a   : > { %872 = vst.msk [vmem:[#allocation2 + $0x8] sm:$0xff] %vm870_vm12, %v838_v51  ;;  %v925_v10 = vpop.permute.xlu0 %924 }
 0x18c   : > { %v786_v55 = vpop.permute.xlu1 %785 }
 0x18d   : > { %816 = vst.msk [vmem:[#allocation2 + $0x10] sm:$0xff] %vm813_vm11, %v786_v55 }
 0x18f   : > { %v952_v12 = vpop.permute.xlu0 %951 }
 0x190   : > { %v796_v57 = vpop.permute.xlu1 %795 }
 0x191   : > { %818 = vst.msk [vmem:[#allocation2 + $0x20] sm:$0xff] %vm813_vm11, %v796_v57 }
 0x192   : > { %875 = vst.msk [vmem:[#allocation2 + $0x20] sm:$0xff] %vm870_vm12, %v853_v54 }
 0x193   : > { %v967_v14 = vpop.permute.xlu0 %966 }
 0x194   : > { %v806_v58 = vpop.permute.xlu1 %805 }
 0x195   : > { %820 = vst.msk [vmem:[#allocation2 + $0x30] sm:$0xff] %vm813_vm11, %v806_v58 }
 0x196   : > { %877 = vst.msk [vmem:[#allocation2 + $0x30] sm:$0xff] %vm870_vm12, %v863_v56 }
 0x197   : > { %v977_v17 = vpop.permute.xlu0 %976 }
 0x199   : > { %v833_v60 = vpop.permute.xlu1 %832 }
 0x19a   : > { %871 = vst.msk [vmem:[#allocation2] sm:$0xff] %vm870_vm12, %v833_v60 }
 0x19b   : > { %928 = vst.msk [vmem:[#allocation2] sm:$0xff] %vm927_vm13, %v890_v59 }
 0x19c   : > { %v1004_v19 = vpop.permute.xlu0 %1003 }
 0x19d   : > { %v843_v62 = vpop.permute.xlu1 %842 }
 0x19e   : > { %873 = vst.msk [vmem:[#allocation2 + $0x10] sm:$0xff] %vm870_vm12, %v843_v62 }
 0x1a0   : > { %v1019_v21 = vpop.permute.xlu0 %1018 }
 0x1a1   : > { %v848_v0 = vpop.permute.xlu1 %847 }
 0x1a2   : > { %874 = vst.msk [vmem:[#allocation2 + $0x18] sm:$0xff] %vm870_vm12, %v848_v0 }
 0x1a3   : > { %931 = vst.msk [vmem:[#allocation2 + $0x18] sm:$0xff] %vm927_vm13, %v905_v61 }
 0x1a4   : > { %v1029_v27 = vpop.permute.xlu0 %1028 }
 0x1a5   : > { %v858_v9 = vpop.permute.xlu1 %857 }
 0x1a6   : > { %876 = vst.msk [vmem:[#allocation2 + $0x28] sm:$0xff] %vm870_vm12, %v858_v9 }
 0x1a7   : > { %933 = vst.msk [vmem:[#allocation2 + $0x28] sm:$0xff] %vm927_vm13, %v915_v63 }
 0x1a8   : > { %v1039_v34 = vpop.permute.xlu0 %1038 }
 0x1a9   : > { %v868_v11 = vpop.permute.xlu1 %867 }
 0x1aa   : > { %878 = vst.msk [vmem:[#allocation2 + $0x38] sm:$0xff] %vm870_vm12, %v868_v11 }
 0x1ab   : > { %935 = vst.msk [vmem:[#allocation2 + $0x38] sm:$0xff] %vm927_vm13, %v925_v10 }
 0x1ae   : > { %v895_v13 = vpop.permute.xlu1 %894 }
 0x1af   : > { %929 = vst.msk [vmem:[#allocation2 + $0x8] sm:$0xff] %vm927_vm13, %v895_v13 }
 0x1b0   : > { %986 = vst.msk [vmem:[#allocation2 + $0x8] sm:$0xff] %vm984_vm14, %v952_v12 }
 0x1b2   : > { %v900_v15 = vpop.permute.xlu1 %899 }
 0x1b3   : > { %930 = vst.msk [vmem:[#allocation2 + $0x10] sm:$0xff] %vm927_vm13, %v900_v15 }
 0x1b6   : > { %v910_v16 = vpop.permute.xlu1 %909 }
 0x1b7   : > { %932 = vst.msk [vmem:[#allocation2 + $0x20] sm:$0xff] %vm927_vm13, %v910_v16 }
 0x1b8   : > { %989 = vst.msk [vmem:[#allocation2 + $0x20] sm:$0xff] %vm984_vm14, %v967_v14 }
 0x1ba   : > { %v920_v18 = vpop.permute.xlu1 %919 }
 0x1bb   : > { %934 = vst.msk [vmem:[#allocation2 + $0x30] sm:$0xff] %vm927_vm13, %v920_v18 }
 0x1bc   : > { %991 = vst.msk [vmem:[#allocation2 + $0x30] sm:$0xff] %vm984_vm14, %v977_v17 }
 0x1bf   : > { %v947_v20 = vpop.permute.xlu1 %946 }
 0x1c0   : > { %985 = vst.msk [vmem:[#allocation2] sm:$0xff] %vm984_vm14, %v947_v20 }
 0x1c1   : > { %1042 = vst.msk [vmem:[#allocation2] sm:$0xff] %vm1041_vm15, %v1004_v19 }
 0x1c3   : > { %v957_v22 = vpop.permute.xlu1 %956 }
 0x1c4   : > { %987 = vst.msk [vmem:[#allocation2 + $0x10] sm:$0xff] %vm984_vm14, %v957_v22 }
 0x1c7   : > { %v962_v23 = vpop.permute.xlu1 %961 }
 0x1c8   : > { %988 = vst.msk [vmem:[#allocation2 + $0x18] sm:$0xff] %vm984_vm14, %v962_v23  ;;  %v1533_v24 = vld [vmem:[#allocation2] ss:$0 sm:$0xff]  ;;  %v1537_v25 = vld [vmem:[#allocation2 + $0x1] ss:$0 sm:$0xff] }
 0x1c9   : > { %v1541_v26 = vld [vmem:[#allocation2 + $0x2] ss:$0 sm:$0xff]  ;;  %1071 = vst.msk [vmem:[%s2221_s25] sm:$0x3] %vm1070_vm0, %v1533_v24  ;;  %1095 = vst.msk [vmem:[%s2221_s25 + $0x2] sm:$0x3] %vm1070_vm0, %v1537_v25 }
 0x1ca   : > { %1119 = vst.msk [vmem:[%s2221_s25 + $0x4] sm:$0x3] %vm1070_vm0, %v1541_v26  ;;  %v1545_v28 = vld [vmem:[#allocation2 + $0x3] ss:$0 sm:$0xff]  ;;  %v1549_v29 = vld [vmem:[#allocation2 + $0x4] ss:$0 sm:$0xff] }
 0x1cb   : > { %v1553_v30 = vld [vmem:[#allocation2 + $0x5] ss:$0 sm:$0xff]  ;;  %1045 = vst.msk [vmem:[#allocation2 + $0x18] sm:$0xff] %vm1041_vm15, %v1019_v21  ;;  %v1557_v31 = vld [vmem:[#allocation2 + $0x6] ss:$0 sm:$0xff]  ;;  %v972_v33 = vpop.permute.xlu1 %971 }
 0x1cc   : > { %1143 = vst.msk [vmem:[%s2221_s25 + $0x6] sm:$0x3] %vm1070_vm0, %v1545_v28  ;;  %1167 = vst.msk [vmem:[%s2221_s25 + $0x8] sm:$0x3] %vm1070_vm0, %v1549_v29  ;;  %v1561_v32 = vld [vmem:[#allocation2 + $0x7] ss:$0 sm:$0xff] }
 0x1cd   : > { %1191 = vst.msk [vmem:[%s2221_s25 + $0xa] sm:$0x3] %vm1070_vm0, %v1553_v30  ;;  %1215 = vst.msk [vmem:[%s2221_s25 + $0xc] sm:$0x3] %vm1070_vm0, %v1557_v31 }
 0x1ce   : > { %1239 = vst.msk [vmem:[%s2221_s25 + $0xe] sm:$0x3] %vm1070_vm0, %v1561_v32 }
 0x1cf   : > { %990 = vst.msk [vmem:[#allocation2 + $0x28] sm:$0xff] %vm984_vm14, %v972_v33  ;;  %v982_v35 = vpop.permute.xlu1 %981 }
 0x1d0   : > { %1047 = vst.msk [vmem:[#allocation2 + $0x28] sm:$0xff] %vm1041_vm15, %v1029_v27 }
 0x1d1   : > { %992 = vst.msk [vmem:[#allocation2 + $0x38] sm:$0xff] %vm984_vm14, %v982_v35 }
 0x1d2   : > { %v1566_v36 = vld [vmem:[#allocation2 + $0x18] ss:$0 sm:$0xff]  ;;  %v1570_v2 = vld [vmem:[#allocation2 + $0x19] ss:$0 sm:$0xff]  ;;  %v1574_v37 = vld [vmem:[#allocation2 + $0x1a] ss:$0 sm:$0xff] }
 0x1d3   : > { %1264 = vst.msk [vmem:[%s2221_s25 + $0x30] sm:$0x3] %vm1070_vm0, %v1566_v36  ;;  %1288 = vst.msk [vmem:[%s2221_s25 + $0x32] sm:$0x3] %vm1070_vm0, %v1570_v2  ;;  %v1578_v38 = vld [vmem:[#allocation2 + $0x1b] ss:$0 sm:$0xff] }
 0x1d4   : > { %1312 = vst.msk [vmem:[%s2221_s25 + $0x34] sm:$0x3] %vm1070_vm0, %v1574_v37  ;;  %v1582_v3 = vld [vmem:[#allocation2 + $0x1c] ss:$0 sm:$0xff]  ;;  %v1586_v5 = vld [vmem:[#allocation2 + $0x1d] ss:$0 sm:$0xff]  ;;  %v1009_v1 = vpop.permute.xlu1 %1008 }
 0x1d5   : > { %1049 = vst.msk [vmem:[#allocation2 + $0x38] sm:$0xff] %vm1041_vm15, %v1039_v34  ;;  %v1590_v39 = vld [vmem:[#allocation2 + $0x1e] ss:$0 sm:$0xff]  ;;  %v1594_v7 = vld [vmem:[#allocation2 + $0x1f] ss:$0 sm:$0xff]  ;;  %1043 = vst.msk [vmem:[#allocation2 + $0x8] sm:$0xff] %vm1041_vm15, %v1009_v1 }
 0x1d6   : > { %1336 = vst.msk [vmem:[%s2221_s25 + $0x36] sm:$0x3] %vm1070_vm0, %v1578_v38  ;;  %1360 = vst.msk [vmem:[%s2221_s25 + $0x38] sm:$0x3] %vm1070_vm0, %v1582_v3 }
 0x1d7   : > { %1384 = vst.msk [vmem:[%s2221_s25 + $0x3a] sm:$0x3] %vm1070_vm0, %v1586_v5  ;;  %1408 = vst.msk [vmem:[%s2221_s25 + $0x3c] sm:$0x3] %vm1070_vm0, %v1590_v39  ;;  %v1567_v40 = vld [vmem:[#allocation2 + $0x28] ss:$0 sm:$0xff] }
 0x1d8   : > { %1432 = vst.msk [vmem:[%s2221_s25 + $0x3e] sm:$0x3] %vm1070_vm0, %v1594_v7  ;;  %v1571_v4 = vld [vmem:[#allocation2 + $0x29] ss:$0 sm:$0xff]  ;;  %v1575_v41 = vld [vmem:[#allocation2 + $0x2a] ss:$0 sm:$0xff]  ;;  %v1014_v48 = vpop.permute.xlu1 %1013 }
 0x1d9   : > { %1265 = vst.msk [vmem:[%s2221_s25 + $0x50] sm:$0x3] %vm1070_vm0, %v1567_v40  ;;  %1289 = vst.msk [vmem:[%s2221_s25 + $0x52] sm:$0x3] %vm1070_vm0, %v1571_v4  ;;  %v1579_v42 = vld [vmem:[#allocation2 + $0x2b] ss:$0 sm:$0xff] }
 0x1da   : > { %1313 = vst.msk [vmem:[%s2221_s25 + $0x54] sm:$0x3] %vm1070_vm0, %v1575_v41  ;;  %v1583_v43 = vld [vmem:[#allocation2 + $0x2c] ss:$0 sm:$0xff]  ;;  %v1587_v6 = vld [vmem:[#allocation2 + $0x2d] ss:$0 sm:$0xff] }
 0x1db   : > { %1337 = vst.msk [vmem:[%s2221_s25 + $0x56] sm:$0x3] %vm1070_vm0, %v1579_v42  ;;  %1361 = vst.msk [vmem:[%s2221_s25 + $0x58] sm:$0x3] %vm1070_vm0, %v1583_v43  ;;  %v1591_v44 = vld [vmem:[#allocation2 + $0x2e] ss:$0 sm:$0xff] }
 0x1dc   : > { %1385 = vst.msk [vmem:[%s2221_s25 + $0x5a] sm:$0x3] %vm1070_vm0, %v1587_v6  ;;  %v1595_v8 = vld [vmem:[#allocation2 + $0x2f] ss:$0 sm:$0xff]  ;;  %1409 = vst.msk [vmem:[%s2221_s25 + $0x5c] sm:$0x3] %vm1070_vm0, %v1591_v44  ;;  %v1024_v57 = vpop.permute.xlu1 %1023 }
 0x1dd   : > { %1433 = vst.msk [vmem:[%s2221_s25 + $0x5e] sm:$0x3] %vm1070_vm0, %v1595_v8  ;;  %v1568_v45 = vld [vmem:[#allocation2 + $0x38] ss:$0 sm:$0xff]  ;;  %v1572_v46 = vld [vmem:[#allocation2 + $0x39] ss:$0 sm:$0xff] }
 0x1de   : > { %v1576_v47 = vld [vmem:[#allocation2 + $0x3a] ss:$0 sm:$0xff]  ;;  %1266 = vst.msk [vmem:[%s2221_s25 + $0x70] sm:$0x3] %vm1070_vm0, %v1568_v45  ;;  %1290 = vst.msk [vmem:[%s2221_s25 + $0x72] sm:$0x3] %vm1070_vm0, %v1572_v46 }
 0x1df   : > { %1314 = vst.msk [vmem:[%s2221_s25 + $0x74] sm:$0x3] %vm1070_vm0, %v1576_v47  ;;  %v1580_v49 = vld [vmem:[#allocation2 + $0x3b] ss:$0 sm:$0xff]  ;;  %v1584_v50 = vld [vmem:[#allocation2 + $0x3c] ss:$0 sm:$0xff] }
 0x1e0   : > { %v1588_v51 = vld [vmem:[#allocation2 + $0x3d] ss:$0 sm:$0xff]  ;;  %1044 = vst.msk [vmem:[#allocation2 + $0x10] sm:$0xff] %vm1041_vm15, %v1014_v48  ;;  %v1592_v52 = vld [vmem:[#allocation2 + $0x3e] ss:$0 sm:$0xff]  ;;  %1046 = vst.msk [vmem:[#allocation2 + $0x20] sm:$0xff] %vm1041_vm15, %v1024_v57  ;;  %v1034_v10 = vpop.permute.xlu1 %1033 }
 0x1e1   : > { %1338 = vst.msk [vmem:[%s2221_s25 + $0x76] sm:$0x3] %vm1070_vm0, %v1580_v49  ;;  %1362 = vst.msk [vmem:[%s2221_s25 + $0x78] sm:$0x3] %vm1070_vm0, %v1584_v50  ;;  %v1596_v53 = vld [vmem:[#allocation2 + $0x3f] ss:$0 sm:$0xff] }
 0x1e2   : > { %1386 = vst.msk [vmem:[%s2221_s25 + $0x7a] sm:$0x3] %vm1070_vm0, %v1588_v51  ;;  %1410 = vst.msk [vmem:[%s2221_s25 + $0x7c] sm:$0x3] %vm1070_vm0, %v1592_v52  ;;  %v1565_v54 = vld [vmem:[#allocation2 + $0x8] ss:$0 sm:$0xff] }
 0x1e3   : > { %1434 = vst.msk [vmem:[%s2221_s25 + $0x7e] sm:$0x3] %vm1070_vm0, %v1596_v53  ;;  %v1569_v55 = vld [vmem:[#allocation2 + $0x9] ss:$0 sm:$0xff]  ;;  %v1573_v56 = vld [vmem:[#allocation2 + $0xa] ss:$0 sm:$0xff] }
 0x1e4   : > { %1263 = vst.msk [vmem:[%s2221_s25 + $0x10] sm:$0x3] %vm1070_vm0, %v1565_v54  ;;  %1287 = vst.msk [vmem:[%s2221_s25 + $0x12] sm:$0x3] %vm1070_vm0, %v1569_v55  ;;  %v1577_v58 = vld [vmem:[#allocation2 + $0xb] ss:$0 sm:$0xff] }
 0x1e5   : > { %1311 = vst.msk [vmem:[%s2221_s25 + $0x14] sm:$0x3] %vm1070_vm0, %v1573_v56  ;;  %v1581_v59 = vld [vmem:[#allocation2 + $0xc] ss:$0 sm:$0xff]  ;;  %v1585_v60 = vld [vmem:[#allocation2 + $0xd] ss:$0 sm:$0xff] }
 0x1e6   : > { %1335 = vst.msk [vmem:[%s2221_s25 + $0x16] sm:$0x3] %vm1070_vm0, %v1577_v58  ;;  %1359 = vst.msk [vmem:[%s2221_s25 + $0x18] sm:$0x3] %vm1070_vm0, %v1581_v59  ;;  %v1589_v61 = vld [vmem:[#allocation2 + $0xe] ss:$0 sm:$0xff] }
 0x1e7   : > { %1383 = vst.msk [vmem:[%s2221_s25 + $0x1a] sm:$0x3] %vm1070_vm0, %v1585_v60  ;;  %v1593_v62 = vld [vmem:[#allocation2 + $0xf] ss:$0 sm:$0xff]  ;;  %1407 = vst.msk [vmem:[%s2221_s25 + $0x1c] sm:$0x3] %vm1070_vm0, %v1589_v61 }
 0x1e8   : > { %1431 = vst.msk [vmem:[%s2221_s25 + $0x1e] sm:$0x3] %vm1070_vm0, %v1593_v62  ;;  %v1534_v63 = vld [vmem:[#allocation2 + $0x10] ss:$0 sm:$0xff]  ;;  %v1538_v0 = vld [vmem:[#allocation2 + $0x11] ss:$0 sm:$0xff] }
 0x1e9   : > { %v1542_v9 = vld [vmem:[#allocation2 + $0x12] ss:$0 sm:$0xff]  ;;  %1072 = vst.msk [vmem:[%s2221_s25 + $0x20] sm:$0x3] %vm1070_vm0, %v1534_v63  ;;  %1096 = vst.msk [vmem:[%s2221_s25 + $0x22] sm:$0x3] %vm1070_vm0, %v1538_v0 }
 0x1ea   : > { %1120 = vst.msk [vmem:[%s2221_s25 + $0x24] sm:$0x3] %vm1070_vm0, %v1542_v9  ;;  %v1546_v11 = vld [vmem:[#allocation2 + $0x13] ss:$0 sm:$0xff]  ;;  %v1550_v12 = vld [vmem:[#allocation2 + $0x14] ss:$0 sm:$0xff] }
 0x1eb   : > { %v1554_v13 = vld [vmem:[#allocation2 + $0x15] ss:$0 sm:$0xff]  ;;  %1048 = vst.msk [vmem:[#allocation2 + $0x30] sm:$0xff] %vm1041_vm15, %v1034_v10  ;;  %v1558_v14 = vld [vmem:[#allocation2 + $0x16] ss:$0 sm:$0xff] }
 0x1ec   : > { %1144 = vst.msk [vmem:[%s2221_s25 + $0x26] sm:$0x3] %vm1070_vm0, %v1546_v11  ;;  %1168 = vst.msk [vmem:[%s2221_s25 + $0x28] sm:$0x3] %vm1070_vm0, %v1550_v12  ;;  %v1562_v15 = vld [vmem:[#allocation2 + $0x17] ss:$0 sm:$0xff] }
 0x1ed   : > { %1192 = vst.msk [vmem:[%s2221_s25 + $0x2a] sm:$0x3] %vm1070_vm0, %v1554_v13  ;;  %1216 = vst.msk [vmem:[%s2221_s25 + $0x2c] sm:$0x3] %vm1070_vm0, %v1558_v14  ;;  %v1535_v16 = vld [vmem:[#allocation2 + $0x20] ss:$0 sm:$0xff] }
 0x1ee   : > { %1240 = vst.msk [vmem:[%s2221_s25 + $0x2e] sm:$0x3] %vm1070_vm0, %v1562_v15  ;;  %v1539_v17 = vld [vmem:[#allocation2 + $0x21] ss:$0 sm:$0xff]  ;;  %v1543_v18 = vld [vmem:[#allocation2 + $0x22] ss:$0 sm:$0xff] }
 0x1ef   : > { %1073 = vst.msk [vmem:[%s2221_s25 + $0x40] sm:$0x3] %vm1070_vm0, %v1535_v16  ;;  %1097 = vst.msk [vmem:[%s2221_s25 + $0x42] sm:$0x3] %vm1070_vm0, %v1539_v17  ;;  %v1547_v19 = vld [vmem:[#allocation2 + $0x23] ss:$0 sm:$0xff] }
 0x1f0   : > { %1121 = vst.msk [vmem:[%s2221_s25 + $0x44] sm:$0x3] %vm1070_vm0, %v1543_v18  ;;  %v1551_v20 = vld [vmem:[#allocation2 + $0x24] ss:$0 sm:$0xff]  ;;  %v1555_v21 = vld [vmem:[#allocation2 + $0x25] ss:$0 sm:$0xff] }
 0x1f1   : > { %1145 = vst.msk [vmem:[%s2221_s25 + $0x46] sm:$0x3] %vm1070_vm0, %v1547_v19  ;;  %1169 = vst.msk [vmem:[%s2221_s25 + $0x48] sm:$0x3] %vm1070_vm0, %v1551_v20  ;;  %v1559_v22 = vld [vmem:[#allocation2 + $0x26] ss:$0 sm:$0xff] }
 0x1f2   : > { %1193 = vst.msk [vmem:[%s2221_s25 + $0x4a] sm:$0x3] %vm1070_vm0, %v1555_v21  ;;  %v1563_v23 = vld [vmem:[#allocation2 + $0x27] ss:$0 sm:$0xff]  ;;  %1217 = vst.msk [vmem:[%s2221_s25 + $0x4c] sm:$0x3] %vm1070_vm0, %v1559_v22 }
 0x1f3   : > { %1241 = vst.msk [vmem:[%s2221_s25 + $0x4e] sm:$0x3] %vm1070_vm0, %v1563_v23  ;;  %v1536_v24 = vld [vmem:[#allocation2 + $0x30] ss:$0 sm:$0xff]  ;;  %v1540_v25 = vld [vmem:[#allocation2 + $0x31] ss:$0 sm:$0xff] }
 0x1f4   : > { %v1544_v26 = vld [vmem:[#allocation2 + $0x32] ss:$0 sm:$0xff]  ;;  %1074 = vst.msk [vmem:[%s2221_s25 + $0x60] sm:$0x3] %vm1070_vm0, %v1536_v24  ;;  %1098 = vst.msk [vmem:[%s2221_s25 + $0x62] sm:$0x3] %vm1070_vm0, %v1540_v25 }
 0x1f5   : > { %1122 = vst.msk [vmem:[%s2221_s25 + $0x64] sm:$0x3] %vm1070_vm0, %v1544_v26  ;;  %v1548_v27 = vld [vmem:[#allocation2 + $0x33] ss:$0 sm:$0xff]  ;;  %v1552_v28 = vld [vmem:[#allocation2 + $0x34] ss:$0 sm:$0xff] }
 0x1f6   : > { %v1556_v29 = vld [vmem:[#allocation2 + $0x35] ss:$0 sm:$0xff]  ;;  %1146 = vst.msk [vmem:[%s2221_s25 + $0x66] sm:$0x3] %vm1070_vm0, %v1548_v27  ;;  %1170 = vst.msk [vmem:[%s2221_s25 + $0x68] sm:$0x3] %vm1070_vm0, %v1552_v28 }
 0x1f7   : > { %1194 = vst.msk [vmem:[%s2221_s25 + $0x6a] sm:$0x3] %vm1070_vm0, %v1556_v29  ;;  %v1560_v30 = vld [vmem:[#allocation2 + $0x36] ss:$0 sm:$0xff]  ;;  %v1564_v31 = vld [vmem:[#allocation2 + $0x37] ss:$0 sm:$0xff] }
 0x1f8   : > { %1218 = vst.msk [vmem:[%s2221_s25 + $0x6c] sm:$0x3] %vm1070_vm0, %v1560_v30  ;;  %1242 = vst.msk [vmem:[%s2221_s25 + $0x6e] sm:$0x3] %vm1070_vm0, %v1564_v31 }
 0x1f9   : > { %1748 = shalt.err (!%p1745_p2)
}
 0x1fa   : > { %s1749_s14 = scalar_lea.hbm %s2355_s2, 2048  ;;  %s1753_s21 = scalar_lea.hbm %s2412_s1, 4096 }
 0x1fb   : > { %p1750_p4 = scmp.ne.s32.totalorder %s2355_s2, %s1749_s14  ;;  %p1754_p9 = scmp.lt.u32.totalorder %s2355_s2, %s2412_s1 }
 0x1fc   : > { %p1755_p1 = scmp.lt.u32.totalorder %s1753_s21, %s1749_s14  ;;  %p1757_p6 = scmp.lt.u32.totalorder %s1749_s14, %s2355_s2 }
 0x1fd   : > { %p1751_p5 = pnand %p1750_p4, %p2419_p11 }
 0x1fe   : > { %p1756_p3 = por %p1755_p1, %p1754_p9 }
 0x1ff   : > { %p1752_p7 = pneg %p1751_p5 }
 0x200   : > { %p1758_p12 = por %p1757_p6, %p1756_p3 }
 0x202   : > { %p1759_p13 = pnand %p1758_p12, %p1752_p7 }
 0x204   : > { %1762 = shalt.err (!%p1759_p13)
}
 0x205   : > { %s1823_s26 = smov 128   ;;  %s1824_s30 = smov 8  }
 0x206   : > { %1609 = dma.vmem_to_hbm [thread:$0]  (%p2419_p11), %s2357_s10, 2048, %s2355_s2, %s1436_s3, %s1823_s26, %s1823_s26, %s1824_s30  }
 0x207 PF: > { %s1465_s17 = sand.u32 1, %s1789_s6   ;;  %p2420_p8 = scmp.ne.s32.totalorder %s2417_s19, 0 }
 0x208   : > { %p2421_p10 = scmp.ge.s32.totalorder %s1801_s9, 2  ;;  %s1466_s25 = scalar_lea.sflag [#allocation5], %s1465_s17 }
 0x20a   : > { %p1616_p0 = pnand %p2421_p10, %p2420_p8 }
 0x20c   : > { %1784 = dma.done.wait (!%p1616_p0), %s1466_s25, 2048  }
 0x20d   : > { %1786 = vsyncadd (!%p1616_p0), %s1466_s25, 4294965248  ;;  %p14_p2 = scmp.ge.s32.totalorder %s1860_s12, 4   ;;  %s2422_s6 = smov %s1793_s7 }
 0x20e   : > { %s2423_s7 = smov %s1797_s8  ;;  %s2424_s8 = smov %s1872_s15 }
 0x20f   : > { %s2425_s9 = smov %s1860_s12  ;;  %16 = sbr.rel (!%p14_p2) target bundleno = 5 (0x5), region = 69 }
 0x216   :  { %1471 = vsyncpa [#allocation4], 1 }
 0x217   :  { %1473 = vsyncpa [#allocation4 + $0x1], 1 }
 0x218   :  { %1474 = vsyncpa [#allocation5], 1 }
 0x219   :  { %1476 = vsyncpa [#allocation5 + $0x1], 1 }

</bundles_post_ra>
